<compile_context>
chip_gen: v6e
topology: v6e:2x2x1
jax: 0.10.0
libtpu: 0.0.40
codegen_flags: <defaults>
</compile_context>

<pallas_src>
import jax
import jax.numpy as jnp
from jax.experimental import pallas as pl
from jax.experimental.pallas import tpu as pltpu

LEAKY_SLOPE = 0.01   # nn.LeakyReLU() default
BN_EPS = 1e-5        # nn.BatchNorm2d default


# ----------------------------- Pallas kernels -----------------------------

def _deconv_bn_lrelu_kernel(p_ref, w_ref, b_ref, g_ref, bt_ref, o_ref):
    # (Cout, K) @ (K, M) on the MXU with f32 accumulation (operands are bf16).
    y = jnp.dot(w_ref[...], p_ref[...], preferred_element_type=jnp.float32)
    y = y + b_ref[...]                                   # (Cout, M) + (Cout, 1)
    # training-mode BatchNorm2d: batch stats over M = N*OH*OW, biased variance.
    mean = jnp.mean(y, axis=1, keepdims=True)            # cross-lane reduce (XLU)
    var = jnp.mean(jnp.square(y - mean), axis=1, keepdims=True)
    scale = g_ref[...] * jax.lax.rsqrt(var + BN_EPS)     # (Cout, 1), EUP rsqrt
    shift = bt_ref[...] - mean * scale                   # (Cout, 1)
    out = y * scale + shift                              # single mul+add pass
    out = jnp.where(out >= 0, out, LEAKY_SLOPE * out)    # LeakyReLU(0.01)
    o_ref[...] = out.astype(o_ref.dtype)


def _conv_bias_kernel(p_ref, w_ref, b_ref, o_ref):
    # Final Conv2d: matmul + bias only.
    o_ref[...] = (jnp.dot(w_ref[...], p_ref[...],
                          preferred_element_type=jnp.float32)
                  + b_ref[...]).astype(o_ref.dtype)


def _full_spec(shape):
    nd = len(shape)
    return pl.BlockSpec(shape, lambda i: (0,) * nd)


def fused_deconv_block(p, w_eq, b, gamma, beta, out_dtype):
    # p: (K, M) bf16 patches^T; w_eq: (Cout, K) bf16; b/gamma/beta: (Cout,) f32
    K, M = p.shape
    cout = w_eq.shape[0]
    return pl.pallas_call(
        _deconv_bn_lrelu_kernel,
        out_shape=jax.ShapeDtypeStruct((cout, M), out_dtype),
        grid=(1,),
        in_specs=[_full_spec((K, M)), _full_spec((cout, K)),
                  _full_spec((cout, 1)), _full_spec((cout, 1)),
                  _full_spec((cout, 1))],
        out_specs=_full_spec((cout, M)),
        compiler_params=pltpu.CompilerParams(
            dimension_semantics=("arbitrary",)),
    )(p, w_eq,
      b.reshape(cout, 1).astype(jnp.float32),
      gamma.reshape(cout, 1).astype(jnp.float32),
      beta.reshape(cout, 1).astype(jnp.float32))


def conv_bias(p, w_eq, b):
    K, M = p.shape
    cout = w_eq.shape[0]
    return pl.pallas_call(
        _conv_bias_kernel,
        out_shape=jax.ShapeDtypeStruct((cout, M), jnp.float32),
        grid=(1,),
        in_specs=[_full_spec((K, M)), _full_spec((cout, K)),
                  _full_spec((cout, 1))],
        out_specs=_full_spec((cout, M)),
        compiler_params=pltpu.CompilerParams(
            dimension_semantics=("arbitrary",)),
    )(p, w_eq, b.reshape(cout, 1).astype(jnp.float32))


# ------------------------------- glue (JAX) -------------------------------

def _patches_T(xp):
    # xp: (C, N, Hp, Wp) padded (and possibly zero-dilated) input.
    # Returns (9*C, N*oh*ow) bf16 patches^T; K ordered (ky, kx, c) to match the
    # weight re-layouts below.  (im2col stays in the XLA wrapper: at these
    # sizes the materialized patches are <= ~0.3 MiB in bf16.)
    c, n, hp, wp = xp.shape
    oh, ow = hp - 2, wp - 2
    xp = xp.astype(jnp.bfloat16)
    cols = jnp.stack([xp[:, :, ky:ky + oh, kx:kx + ow]
                      for ky in range(3) for kx in range(3)], axis=0)
    return cols.reshape(9 * c, n * oh * ow), (n, oh, ow)


def deconv_bn_lrelu(x, blk, out_dtype=jnp.bfloat16):
    # x: (Cin, N, H, W);  blk["w"]: PyTorch ConvTranspose2d layout
    # (Cin, Cout, 3, 3); kernel_size=3, padding=1 (as in the module).
    cin, n, h, w = x.shape
    cout = blk["w"].shape[1]
    s, op = blk["stride"], blk["output_padding"]
    if s > 1:
        # zero-dilate the input (stride-1 zeros between pixels)
        xd = jnp.zeros((cin, n, (h - 1) * s + 1, (w - 1) * s + 1), x.dtype)
        xd = xd.at[:, :, ::s, ::s].set(x)
    else:
        xd = x
    # TODO(synk): stride-2 deconvs still matmul over the zero-dilated input
    # (~4x extra MXU work); sub-pixel phase decomposition would remove it.
    pad_lo = 3 - 1 - 1                      # k - 1 - padding = 1
    pad_hi = pad_lo + op
    xp = jnp.pad(xd, ((0, 0), (0, 0), (pad_lo, pad_hi), (pad_lo, pad_hi)))
    p, (n_, oh, ow) = _patches_T(xp)
    # equivalent direct-conv weight: flip spatially, (Cout, ky, kx, Cin)
    w_eq = (jnp.flip(blk["w"], axis=(2, 3))
            .transpose(1, 2, 3, 0).reshape(cout, 9 * cin)
            .astype(jnp.bfloat16))
    y = fused_deconv_block(p, w_eq, blk["b"], blk["gamma"], blk["beta"],
                           out_dtype)
    return y.reshape(cout, n_, oh, ow)


def conv2d(x, w, b):
    # x: (Cin, N, H, W); w: PyTorch Conv2d layout (Cout, Cin, 3, 3);
    # stride=1, padding=1.
    cin, n, h, wd = x.shape
    cout = w.shape[0]
    xp = jnp.pad(x, ((0, 0), (0, 0), (1, 1), (1, 1)))
    p, _ = _patches_T(xp)
    w_eq = w.transpose(0, 2, 3, 1).reshape(cout, 9 * cin).astype(jnp.bfloat16)
    y = conv_bias(p, w_eq, b)
    return y.reshape(cout, n, h, wd)


# --------------------------- model construction ---------------------------

def get_decoder_stride_sizes(image_dim, num_layers):
    # Mirror of the encoder downsampling: stride 2 wherever the size is even.
    strides, s = [], image_dim
    for _ in range(num_layers):
        if s % 2 == 0:
            strides.append(2)
            s //= 2
        else:
            strides.append(1)
    return list(reversed(strides))


def init_decoder_params(key, image_size, hidden_dims):
    strides = get_decoder_stride_sizes(image_size[1], len(hidden_dims))
    blocks = []
    # deconv blocks: hidden_dims[i] -> hidden_dims[i+1]
    for i in range(len(hidden_dims) - 1):
        cin, cout, s = hidden_dims[i], hidden_dims[i + 1], strides[i]
        key, kw, kb = jax.random.split(key, 3)
        scale = 1.0 / jnp.sqrt(cin * 9.0)
        blocks.append(dict(
            w=jax.random.normal(kw, (cin, cout, 3, 3), jnp.float32) * scale,
            b=jax.random.normal(kb, (cout,), jnp.float32) * scale,
            gamma=jnp.ones((cout,), jnp.float32),
            beta=jnp.zeros((cout,), jnp.float32),
            stride=s, output_padding=s - 1))
    # last deconv block: hidden_dims[-1] -> hidden_dims[-1], output_padding=1
    cin = cout = hidden_dims[-1]
    key, kw, kb = jax.random.split(key, 3)
    scale = 1.0 / jnp.sqrt(cin * 9.0)
    blocks.append(dict(
        w=jax.random.normal(kw, (cin, cout, 3, 3), jnp.float32) * scale,
        b=jax.random.normal(kb, (cout,), jnp.float32) * scale,
        gamma=jnp.ones((cout,), jnp.float32),
        beta=jnp.zeros((cout,), jnp.float32),
        stride=strides[-1], output_padding=1))
    # final Conv2d: hidden_dims[-1] -> image channels
    key, kw, kb = jax.random.split(key, 3)
    scale = 1.0 / jnp.sqrt(hidden_dims[-1] * 9.0)
    final_w = jax.random.normal(
        kw, (image_size[0], hidden_dims[-1], 3, 3), jnp.float32) * scale
    final_b = jax.random.normal(kb, (image_size[0],), jnp.float32) * scale
    return dict(blocks=blocks, final_w=final_w, final_b=final_b), strides


def decoder_forward(params, z_nchw):
    # NCHW -> channel-major (C, N, H, W); intermediate activations stay bf16.
    x = jnp.transpose(z_nchw, (1, 0, 2, 3)).astype(jnp.float32)
    for blk in params["blocks"]:
        x = deconv_bn_lrelu(x, blk, out_dtype=jnp.bfloat16)
    out = conv2d(x, params["final_w"], params["final_b"])   # (C, N, H, W) f32
    return jnp.transpose(out, (1, 0, 2, 3))                  # -> NCHW


# --------------------------------- main -----------------------------------

if __name__ == "__main__":
    image_size = (1, 32, 32)           # (C, H, W)
    hidden_dims = [32, 16, 8, 8]
    batch = 2

    key = jax.random.PRNGKey(0)
    key, kp, kz = jax.random.split(key, 3)
    params, strides = init_decoder_params(kp, image_size, hidden_dims)

    # latent spatial size implied by the decoder strides
    spatial = (image_size[1] - 2) // strides[-1] + 1   # invert last deconv (op=1)
    for s in strides[:-1][::-1]:
        spatial //= s

    z = jax.random.normal(kz, (batch, hidden_dims[0], spatial, spatial),
                          jnp.float32)                 # NCHW latent, like PyTorch

    fwd = jax.jit(lambda zz: decoder_forward(params, zz))
    out = fwd(z)
    out = jax.block_until_ready(out)

    assert out.shape == (batch, image_size[0], image_size[1], image_size[2]), out.shape
    assert bool(jnp.all(jnp.isfinite(out)))
    print("KERNEL_OK")
</pallas_src>

<mosaic_0001>
module attributes {stable_mosaic.version = 11 : i64} {
  func.func @_deconv_bn_lrelu_kernel(%arg0: i32, %arg1: memref<288x32xbf16, #tpu.memory_space<vmem>>, %arg2: memref<16x288xbf16, #tpu.memory_space<vmem>>, %arg3: memref<16x1xf32, #tpu.memory_space<vmem>>, %arg4: memref<16x1xf32, #tpu.memory_space<vmem>>, %arg5: memref<16x1xf32, #tpu.memory_space<vmem>>, %arg6: memref<16x32xbf16, #tpu.memory_space<vmem>>) attributes {dimension_semantics = [#tpu.dimension_semantics<arbitrary>], iteration_bounds = array<i64: 1>, scalar_prefetch = 0 : i64, scratch_operands = 0 : i64, tpu.core_type = #tpu.core_type<tc>, window_params = [{pipeline_mode = #tpu.pipeline_mode<synchronous>, transform_indices = @transform_0, window_bounds = array<i64: 288, 32>}, {pipeline_mode = #tpu.pipeline_mode<synchronous>, transform_indices = @transform_1, window_bounds = array<i64: 16, 288>}, {pipeline_mode = #tpu.pipeline_mode<synchronous>, transform_indices = @transform_2, window_bounds = array<i64: 16, 1>}, {pipeline_mode = #tpu.pipeline_mode<synchronous>, transform_indices = @transform_3, window_bounds = array<i64: 16, 1>}, {pipeline_mode = #tpu.pipeline_mode<synchronous>, transform_indices = @transform_4, window_bounds = array<i64: 16, 1>}, {pipeline_mode = #tpu.pipeline_mode<synchronous>, transform_indices = @transform_5, window_bounds = array<i64: 16, 32>}]} {
    %c0 = arith.constant 0 : index
    %c0_0 = arith.constant 0 : index
    %0 = vector.load %arg2[%c0, %c0_0] : memref<16x288xbf16, #tpu.memory_space<vmem>>, vector<16x288xbf16>
    %c0_1 = arith.constant 0 : index
    %c0_2 = arith.constant 0 : index
    %1 = vector.load %arg1[%c0_1, %c0_2] : memref<288x32xbf16, #tpu.memory_space<vmem>>, vector<288x32xbf16>
    %cst = arith.constant dense<0.000000e+00> : vector<16x32xf32>
    %2 = tpu.matmul %0, %1, %cst {dimension_numbers = #tpu.dot_dimension_numbers<[1], [0], [0], [1], [0, 0, 1, 1], [], []>} : vector<16x288xbf16>, vector<288x32xbf16>, vector<16x32xf32> -> vector<16x32xf32>
    %c0_3 = arith.constant 0 : index
    %c0_4 = arith.constant 0 : index
    %3 = vector.load %arg3[%c0_3, %c0_4] : memref<16x1xf32, #tpu.memory_space<vmem>>, vector<16x1xf32>
    %4 = vector.broadcast %3 : vector<16x1xf32> to vector<16x32xf32>
    %5 = arith.addf %2, %4 : vector<16x32xf32>
    %cst_5 = arith.constant dense<0.000000e+00> : vector<16xf32>
    %6 = vector.multi_reduction <add>, %5, %cst_5 [1] : vector<16x32xf32> to vector<16xf32>
    %7 = vector.shape_cast %6 : vector<16xf32> to vector<16x1xf32>
    %cst_6 = arith.constant 3.200000e+01 : f32
    %8 = vector.broadcast %cst_6 : f32 to vector<16x1xf32>
    %9 = arith.divf %7, %8 : vector<16x1xf32>
    %10 = vector.broadcast %9 : vector<16x1xf32> to vector<16x32xf32>
    %11 = arith.subf %5, %10 : vector<16x32xf32>
    %12 = arith.mulf %11, %11 : vector<16x32xf32>
    %cst_7 = arith.constant dense<0.000000e+00> : vector<16xf32>
    %13 = vector.multi_reduction <add>, %12, %cst_7 [1] : vector<16x32xf32> to vector<16xf32>
    %14 = vector.shape_cast %13 : vector<16xf32> to vector<16x1xf32>
    %cst_8 = arith.constant 3.200000e+01 : f32
    %15 = vector.broadcast %cst_8 : f32 to vector<16x1xf32>
    %16 = arith.divf %14, %15 : vector<16x1xf32>
    %c0_9 = arith.constant 0 : index
    %c0_10 = arith.constant 0 : index
    %17 = vector.load %arg4[%c0_9, %c0_10] : memref<16x1xf32, #tpu.memory_space<vmem>>, vector<16x1xf32>
    %cst_11 = arith.constant 9.99999974E-6 : f32
    %18 = vector.broadcast %cst_11 : f32 to vector<16x1xf32>
    %19 = arith.addf %16, %18 : vector<16x1xf32>
    %20 = math.rsqrt %19 : vector<16x1xf32>
    %21 = arith.mulf %17, %20 : vector<16x1xf32>
    %c0_12 = arith.constant 0 : index
    %c0_13 = arith.constant 0 : index
    %22 = vector.load %arg5[%c0_12, %c0_13] : memref<16x1xf32, #tpu.memory_space<vmem>>, vector<16x1xf32>
    %23 = arith.mulf %9, %21 : vector<16x1xf32>
    %24 = arith.subf %22, %23 : vector<16x1xf32>
    %25 = vector.broadcast %21 : vector<16x1xf32> to vector<16x32xf32>
    %26 = arith.mulf %5, %25 : vector<16x32xf32>
    %27 = vector.broadcast %24 : vector<16x1xf32> to vector<16x32xf32>
    %28 = arith.addf %26, %27 : vector<16x32xf32>
    %cst_14 = arith.constant 0.000000e+00 : f32
    %29 = vector.broadcast %cst_14 : f32 to vector<16x32xf32>
    %30 = arith.cmpf oge, %28, %29 : vector<16x32xf32>
    %cst_15 = arith.constant 0.00999999977 : f32
    %31 = vector.broadcast %cst_15 : f32 to vector<16x32xf32>
    %32 = arith.mulf %31, %28 : vector<16x32xf32>
    %33 = arith.select %30, %28, %32 : vector<16x32xi1>, vector<16x32xf32>
    %34 = arith.truncf %33 : vector<16x32xf32> to vector<16x32xbf16>
    %c0_16 = arith.constant 0 : index
    %c0_17 = arith.constant 0 : index
    %35 = vector.load %arg6[%c0_16, %c0_17] : memref<16x32xbf16, #tpu.memory_space<vmem>>, vector<16x32xbf16>
    tpu.vector_store %arg6[%c0_16, %c0_17], %34 {strides = array<i32>} : memref<16x32xbf16, #tpu.memory_space<vmem>>, vector<16x32xbf16>,
    return
  }
  func.func @transform_0(%arg0: i32) -> (i32, i32) {
    %c0_i32 = arith.constant 0 : i32
    %c0_i32_0 = arith.constant 0 : i32
    %c0_i32_1 = arith.constant 0 : i32
    return %c0_i32, %c0_i32_0 : i32, i32
  }
  func.func @transform_1(%arg0: i32) -> (i32, i32) {
    %c0_i32 = arith.constant 0 : i32
    %c0_i32_0 = arith.constant 0 : i32
    %c0_i32_1 = arith.constant 0 : i32
    return %c0_i32, %c0_i32_0 : i32, i32
  }
  func.func @transform_2(%arg0: i32) -> (i32, i32) {
    %c0_i32 = arith.constant 0 : i32
    %c0_i32_0 = arith.constant 0 : i32
    %c0_i32_1 = arith.constant 0 : i32
    return %c0_i32, %c0_i32_0 : i32, i32
  }
  func.func @transform_3(%arg0: i32) -> (i32, i32) {
    %c0_i32 = arith.constant 0 : i32
    %c0_i32_0 = arith.constant 0 : i32
    %c0_i32_1 = arith.constant 0 : i32
    return %c0_i32, %c0_i32_0 : i32, i32
  }
  func.func @transform_4(%arg0: i32) -> (i32, i32) {
    %c0_i32 = arith.constant 0 : i32
    %c0_i32_0 = arith.constant 0 : i32
    %c0_i32_1 = arith.constant 0 : i32
    return %c0_i32, %c0_i32_0 : i32, i32
  }
  func.func @transform_5(%arg0: i32) -> (i32, i32) {
    %c0_i32 = arith.constant 0 : i32
    %c0_i32_0 = arith.constant 0 : i32
    %c0_i32_1 = arith.constant 0 : i32
    return %c0_i32, %c0_i32_0 : i32, i32
  }
}

module attributes {stable_mosaic.version = 11 : i64} {
  func.func @_deconv_bn_lrelu_kernel(%arg0: i32, %arg1: memref<144x128xbf16, #tpu.memory_space<vmem>>, %arg2: memref<8x144xbf16, #tpu.memory_space<vmem>>, %arg3: memref<8x1xf32, #tpu.memory_space<vmem>>, %arg4: memref<8x1xf32, #tpu.memory_space<vmem>>, %arg5: memref<8x1xf32, #tpu.memory_space<vmem>>, %arg6: memref<8x128xbf16, #tpu.memory_space<vmem>>) attributes {dimension_semantics = [#tpu.dimension_semantics<arbitrary>], iteration_bounds = array<i64: 1>, scalar_prefetch = 0 : i64, scratch_operands = 0 : i64, tpu.core_type = #tpu.core_type<tc>, window_params = [{pipeline_mode = #tpu.pipeline_mode<synchronous>, transform_indices = @transform_0, window_bounds = array<i64: 144, 128>}, {pipeline_mode = #tpu.pipeline_mode<synchronous>, transform_indices = @transform_1, window_bounds = array<i64: 8, 144>}, {pipeline_mode = #tpu.pipeline_mode<synchronous>, transform_indices = @transform_2, window_bounds = array<i64: 8, 1>}, {pipeline_mode = #tpu.pipeline_mode<synchronous>, transform_indices = @transform_3, window_bounds = array<i64: 8, 1>}, {pipeline_mode = #tpu.pipeline_mode<synchronous>, transform_indices = @transform_4, window_bounds = array<i64: 8, 1>}, {pipeline_mode = #tpu.pipeline_mode<synchronous>, transform_indices = @transform_5, window_bounds = array<i64: 8, 128>}]} {
    %c0 = arith.constant 0 : index
    %c0_0 = arith.constant 0 : index
    %0 = vector.load %arg2[%c0, %c0_0] : memref<8x144xbf16, #tpu.memory_space<vmem>>, vector<8x144xbf16>
    %c0_1 = arith.constant 0 : index
    %c0_2 = arith.constant 0 : index
    %1 = vector.load %arg1[%c0_1, %c0_2] : memref<144x128xbf16, #tpu.memory_space<vmem>>, vector<144x128xbf16>
    %cst = arith.constant dense<0.000000e+00> : vector<8x128xf32>
    %2 = tpu.matmul %0, %1, %cst {dimension_numbers = #tpu.dot_dimension_numbers<[1], [0], [0], [1], [0, 0, 1, 1], [], []>} : vector<8x144xbf16>, vector<144x128xbf16>, vector<8x128xf32> -> vector<8x128xf32>
    %c0_3 = arith.constant 0 : index
    %c0_4 = arith.constant 0 : index
    %3 = vector.load %arg3[%c0_3, %c0_4] : memref<8x1xf32, #tpu.memory_space<vmem>>, vector<8x1xf32>
    %4 = vector.broadcast %3 : vector<8x1xf32> to vector<8x128xf32>
    %5 = arith.addf %2, %4 : vector<8x128xf32>
    %cst_5 = arith.constant dense<0.000000e+00> : vector<8xf32>
    %6 = vector.multi_reduction <add>, %5, %cst_5 [1] : vector<8x128xf32> to vector<8xf32>
    %7 = vector.shape_cast %6 : vector<8xf32> to vector<8x1xf32>
    %cst_6 = arith.constant 1.280000e+02 : f32
    %8 = vector.broadcast %cst_6 : f32 to vector<8x1xf32>
    %9 = arith.divf %7, %8 : vector<8x1xf32>
    %10 = vector.broadcast %9 : vector<8x1xf32> to vector<8x128xf32>
    %11 = arith.subf %5, %10 : vector<8x128xf32>
    %12 = arith.mulf %11, %11 : vector<8x128xf32>
    %cst_7 = arith.constant dense<0.000000e+00> : vector<8xf32>
    %13 = vector.multi_reduction <add>, %12, %cst_7 [1] : vector<8x128xf32> to vector<8xf32>
    %14 = vector.shape_cast %13 : vector<8xf32> to vector<8x1xf32>
    %cst_8 = arith.constant 1.280000e+02 : f32
    %15 = vector.broadcast %cst_8 : f32 to vector<8x1xf32>
    %16 = arith.divf %14, %15 : vector<8x1xf32>
    %c0_9 = arith.constant 0 : index
    %c0_10 = arith.constant 0 : index
    %17 = vector.load %arg4[%c0_9, %c0_10] : memref<8x1xf32, #tpu.memory_space<vmem>>, vector<8x1xf32>
    %cst_11 = arith.constant 9.99999974E-6 : f32
    %18 = vector.broadcast %cst_11 : f32 to vector<8x1xf32>
    %19 = arith.addf %16, %18 : vector<8x1xf32>
    %20 = math.rsqrt %19 : vector<8x1xf32>
    %21 = arith.mulf %17, %20 : vector<8x1xf32>
    %c0_12 = arith.constant 0 : index
    %c0_13 = arith.constant 0 : index
    %22 = vector.load %arg5[%c0_12, %c0_13] : memref<8x1xf32, #tpu.memory_space<vmem>>, vector<8x1xf32>
    %23 = arith.mulf %9, %21 : vector<8x1xf32>
    %24 = arith.subf %22, %23 : vector<8x1xf32>
    %25 = vector.broadcast %21 : vector<8x1xf32> to vector<8x128xf32>
    %26 = arith.mulf %5, %25 : vector<8x128xf32>
    %27 = vector.broadcast %24 : vector<8x1xf32> to vector<8x128xf32>
    %28 = arith.addf %26, %27 : vector<8x128xf32>
    %cst_14 = arith.constant 0.000000e+00 : f32
    %29 = vector.broadcast %cst_14 : f32 to vector<8x128xf32>
    %30 = arith.cmpf oge, %28, %29 : vector<8x128xf32>
    %cst_15 = arith.constant 0.00999999977 : f32
    %31 = vector.broadcast %cst_15 : f32 to vector<8x128xf32>
    %32 = arith.mulf %31, %28 : vector<8x128xf32>
    %33 = arith.select %30, %28, %32 : vector<8x128xi1>, vector<8x128xf32>
    %34 = arith.truncf %33 : vector<8x128xf32> to vector<8x128xbf16>
    %c0_16 = arith.constant 0 : index
    %c0_17 = arith.constant 0 : index
    %35 = vector.load %arg6[%c0_16, %c0_17] : memref<8x128xbf16, #tpu.memory_space<vmem>>, vector<8x128xbf16>
    tpu.vector_store %arg6[%c0_16, %c0_17], %34 {strides = array<i32>} : memref<8x128xbf16, #tpu.memory_space<vmem>>, vector<8x128xbf16>,
    return
  }
  func.func @transform_0(%arg0: i32) -> (i32, i32) {
    %c0_i32 = arith.constant 0 : i32
    %c0_i32_0 = arith.constant 0 : i32
    %c0_i32_1 = arith.constant 0 : i32
    return %c0_i32, %c0_i32_0 : i32, i32
  }
  func.func @transform_1(%arg0: i32) -> (i32, i32) {
    %c0_i32 = arith.constant 0 : i32
    %c0_i32_0 = arith.constant 0 : i32
    %c0_i32_1 = arith.constant 0 : i32
    return %c0_i32, %c0_i32_0 : i32, i32
  }
  func.func @transform_2(%arg0: i32) -> (i32, i32) {
    %c0_i32 = arith.constant 0 : i32
    %c0_i32_0 = arith.constant 0 : i32
    %c0_i32_1 = arith.constant 0 : i32
    return %c0_i32, %c0_i32_0 : i32, i32
  }
  func.func @transform_3(%arg0: i32) -> (i32, i32) {
    %c0_i32 = arith.constant 0 : i32
    %c0_i32_0 = arith.constant 0 : i32
    %c0_i32_1 = arith.constant 0 : i32
    return %c0_i32, %c0_i32_0 : i32, i32
  }
  func.func @transform_4(%arg0: i32) -> (i32, i32) {
    %c0_i32 = arith.constant 0 : i32
    %c0_i32_0 = arith.constant 0 : i32
    %c0_i32_1 = arith.constant 0 : i32
    return %c0_i32, %c0_i32_0 : i32, i32
  }
  func.func @transform_5(%arg0: i32) -> (i32, i32) {
    %c0_i32 = arith.constant 0 : i32
    %c0_i32_0 = arith.constant 0 : i32
    %c0_i32_1 = arith.constant 0 : i32
    return %c0_i32, %c0_i32_0 : i32, i32
  }
}

module attributes {stable_mosaic.version = 11 : i64} {
  func.func @_deconv_bn_lrelu_kernel(%arg0: i32, %arg1: memref<72x512xbf16, #tpu.memory_space<vmem>>, %arg2: memref<8x72xbf16, #tpu.memory_space<vmem>>, %arg3: memref<8x1xf32, #tpu.memory_space<vmem>>, %arg4: memref<8x1xf32, #tpu.memory_space<vmem>>, %arg5: memref<8x1xf32, #tpu.memory_space<vmem>>, %arg6: memref<8x512xbf16, #tpu.memory_space<vmem>>) attributes {dimension_semantics = [#tpu.dimension_semantics<arbitrary>], iteration_bounds = array<i64: 1>, scalar_prefetch = 0 : i64, scratch_operands = 0 : i64, tpu.core_type = #tpu.core_type<tc>, window_params = [{pipeline_mode = #tpu.pipeline_mode<synchronous>, transform_indices = @transform_0, window_bounds = array<i64: 72, 512>}, {pipeline_mode = #tpu.pipeline_mode<synchronous>, transform_indices = @transform_1, window_bounds = array<i64: 8, 72>}, {pipeline_mode = #tpu.pipeline_mode<synchronous>, transform_indices = @transform_2, window_bounds = array<i64: 8, 1>}, {pipeline_mode = #tpu.pipeline_mode<synchronous>, transform_indices = @transform_3, window_bounds = array<i64: 8, 1>}, {pipeline_mode = #tpu.pipeline_mode<synchronous>, transform_indices = @transform_4, window_bounds = array<i64: 8, 1>}, {pipeline_mode = #tpu.pipeline_mode<synchronous>, transform_indices = @transform_5, window_bounds = array<i64: 8, 512>}]} {
    %c0 = arith.constant 0 : index
    %c0_0 = arith.constant 0 : index
    %0 = vector.load %arg2[%c0, %c0_0] : memref<8x72xbf16, #tpu.memory_space<vmem>>, vector<8x72xbf16>
    %c0_1 = arith.constant 0 : index
    %c0_2 = arith.constant 0 : index
    %1 = vector.load %arg1[%c0_1, %c0_2] : memref<72x512xbf16, #tpu.memory_space<vmem>>, vector<72x512xbf16>
    %cst = arith.constant dense<0.000000e+00> : vector<8x512xf32>
    %2 = tpu.matmul %0, %1, %cst {dimension_numbers = #tpu.dot_dimension_numbers<[1], [0], [0], [1], [0, 0, 1, 1], [], []>} : vector<8x72xbf16>, vector<72x512xbf16>, vector<8x512xf32> -> vector<8x512xf32>
    %c0_3 = arith.constant 0 : index
    %c0_4 = arith.constant 0 : index
    %3 = vector.load %arg3[%c0_3, %c0_4] : memref<8x1xf32, #tpu.memory_space<vmem>>, vector<8x1xf32>
    %4 = vector.broadcast %3 : vector<8x1xf32> to vector<8x512xf32>
    %5 = arith.addf %2, %4 : vector<8x512xf32>
    %cst_5 = arith.constant dense<0.000000e+00> : vector<8xf32>
    %6 = vector.multi_reduction <add>, %5, %cst_5 [1] : vector<8x512xf32> to vector<8xf32>
    %7 = vector.shape_cast %6 : vector<8xf32> to vector<8x1xf32>
    %cst_6 = arith.constant 5.120000e+02 : f32
    %8 = vector.broadcast %cst_6 : f32 to vector<8x1xf32>
    %9 = arith.divf %7, %8 : vector<8x1xf32>
    %10 = vector.broadcast %9 : vector<8x1xf32> to vector<8x512xf32>
    %11 = arith.subf %5, %10 : vector<8x512xf32>
    %12 = arith.mulf %11, %11 : vector<8x512xf32>
    %cst_7 = arith.constant dense<0.000000e+00> : vector<8xf32>
    %13 = vector.multi_reduction <add>, %12, %cst_7 [1] : vector<8x512xf32> to vector<8xf32>
    %14 = vector.shape_cast %13 : vector<8xf32> to vector<8x1xf32>
    %cst_8 = arith.constant 5.120000e+02 : f32
    %15 = vector.broadcast %cst_8 : f32 to vector<8x1xf32>
    %16 = arith.divf %14, %15 : vector<8x1xf32>
    %c0_9 = arith.constant 0 : index
    %c0_10 = arith.constant 0 : index
    %17 = vector.load %arg4[%c0_9, %c0_10] : memref<8x1xf32, #tpu.memory_space<vmem>>, vector<8x1xf32>
    %cst_11 = arith.constant 9.99999974E-6 : f32
    %18 = vector.broadcast %cst_11 : f32 to vector<8x1xf32>
    %19 = arith.addf %16, %18 : vector<8x1xf32>
    %20 = math.rsqrt %19 : vector<8x1xf32>
    %21 = arith.mulf %17, %20 : vector<8x1xf32>
    %c0_12 = arith.constant 0 : index
    %c0_13 = arith.constant 0 : index
    %22 = vector.load %arg5[%c0_12, %c0_13] : memref<8x1xf32, #tpu.memory_space<vmem>>, vector<8x1xf32>
    %23 = arith.mulf %9, %21 : vector<8x1xf32>
    %24 = arith.subf %22, %23 : vector<8x1xf32>
    %25 = vector.broadcast %21 : vector<8x1xf32> to vector<8x512xf32>
    %26 = arith.mulf %5, %25 : vector<8x512xf32>
    %27 = vector.broadcast %24 : vector<8x1xf32> to vector<8x512xf32>
    %28 = arith.addf %26, %27 : vector<8x512xf32>
    %cst_14 = arith.constant 0.000000e+00 : f32
    %29 = vector.broadcast %cst_14 : f32 to vector<8x512xf32>
    %30 = arith.cmpf oge, %28, %29 : vector<8x512xf32>
    %cst_15 = arith.constant 0.00999999977 : f32
    %31 = vector.broadcast %cst_15 : f32 to vector<8x512xf32>
    %32 = arith.mulf %31, %28 : vector<8x512xf32>
    %33 = arith.select %30, %28, %32 : vector<8x512xi1>, vector<8x512xf32>
    %34 = arith.truncf %33 : vector<8x512xf32> to vector<8x512xbf16>
    %c0_16 = arith.constant 0 : index
    %c0_17 = arith.constant 0 : index
    %35 = vector.load %arg6[%c0_16, %c0_17] : memref<8x512xbf16, #tpu.memory_space<vmem>>, vector<8x512xbf16>
    tpu.vector_store %arg6[%c0_16, %c0_17], %34 {strides = array<i32>} : memref<8x512xbf16, #tpu.memory_space<vmem>>, vector<8x512xbf16>,
    return
  }
  func.func @transform_0(%arg0: i32) -> (i32, i32) {
    %c0_i32 = arith.constant 0 : i32
    %c0_i32_0 = arith.constant 0 : i32
    %c0_i32_1 = arith.constant 0 : i32
    return %c0_i32, %c0_i32_0 : i32, i32
  }
  func.func @transform_1(%arg0: i32) -> (i32, i32) {
    %c0_i32 = arith.constant 0 : i32
    %c0_i32_0 = arith.constant 0 : i32
    %c0_i32_1 = arith.constant 0 : i32
    return %c0_i32, %c0_i32_0 : i32, i32
  }
  func.func @transform_2(%arg0: i32) -> (i32, i32) {
    %c0_i32 = arith.constant 0 : i32
    %c0_i32_0 = arith.constant 0 : i32
    %c0_i32_1 = arith.constant 0 : i32
    return %c0_i32, %c0_i32_0 : i32, i32
  }
  func.func @transform_3(%arg0: i32) -> (i32, i32) {
    %c0_i32 = arith.constant 0 : i32
    %c0_i32_0 = arith.constant 0 : i32
    %c0_i32_1 = arith.constant 0 : i32
    return %c0_i32, %c0_i32_0 : i32, i32
  }
  func.func @transform_4(%arg0: i32) -> (i32, i32) {
    %c0_i32 = arith.constant 0 : i32
    %c0_i32_0 = arith.constant 0 : i32
    %c0_i32_1 = arith.constant 0 : i32
    return %c0_i32, %c0_i32_0 : i32, i32
  }
  func.func @transform_5(%arg0: i32) -> (i32, i32) {
    %c0_i32 = arith.constant 0 : i32
    %c0_i32_0 = arith.constant 0 : i32
    %c0_i32_1 = arith.constant 0 : i32
    return %c0_i32, %c0_i32_0 : i32, i32
  }
}

module attributes {stable_mosaic.version = 11 : i64} {
  func.func @_deconv_bn_lrelu_kernel(%arg0: i32, %arg1: memref<72x2048xbf16, #tpu.memory_space<vmem>>, %arg2: memref<8x72xbf16, #tpu.memory_space<vmem>>, %arg3: memref<8x1xf32, #tpu.memory_space<vmem>>, %arg4: memref<8x1xf32, #tpu.memory_space<vmem>>, %arg5: memref<8x1xf32, #tpu.memory_space<vmem>>, %arg6: memref<8x2048xbf16, #tpu.memory_space<vmem>>) attributes {dimension_semantics = [#tpu.dimension_semantics<arbitrary>], iteration_bounds = array<i64: 1>, scalar_prefetch = 0 : i64, scratch_operands = 0 : i64, tpu.core_type = #tpu.core_type<tc>, window_params = [{pipeline_mode = #tpu.pipeline_mode<synchronous>, transform_indices = @transform_0, window_bounds = array<i64: 72, 2048>}, {pipeline_mode = #tpu.pipeline_mode<synchronous>, transform_indices = @transform_1, window_bounds = array<i64: 8, 72>}, {pipeline_mode = #tpu.pipeline_mode<synchronous>, transform_indices = @transform_2, window_bounds = array<i64: 8, 1>}, {pipeline_mode = #tpu.pipeline_mode<synchronous>, transform_indices = @transform_3, window_bounds = array<i64: 8, 1>}, {pipeline_mode = #tpu.pipeline_mode<synchronous>, transform_indices = @transform_4, window_bounds = array<i64: 8, 1>}, {pipeline_mode = #tpu.pipeline_mode<synchronous>, transform_indices = @transform_5, window_bounds = array<i64: 8, 2048>}]} {
    %c0 = arith.constant 0 : index
    %c0_0 = arith.constant 0 : index
    %0 = vector.load %arg2[%c0, %c0_0] : memref<8x72xbf16, #tpu.memory_space<vmem>>, vector<8x72xbf16>
    %c0_1 = arith.constant 0 : index
    %c0_2 = arith.constant 0 : index
    %1 = vector.load %arg1[%c0_1, %c0_2] : memref<72x2048xbf16, #tpu.memory_space<vmem>>, vector<72x2048xbf16>
    %cst = arith.constant dense<0.000000e+00> : vector<8x2048xf32>
    %2 = tpu.matmul %0, %1, %cst {dimension_numbers = #tpu.dot_dimension_numbers<[1], [0], [0], [1], [0, 0, 1, 1], [], []>} : vector<8x72xbf16>, vector<72x2048xbf16>, vector<8x2048xf32> -> vector<8x2048xf32>
    %c0_3 = arith.constant 0 : index
    %c0_4 = arith.constant 0 : index
    %3 = vector.load %arg3[%c0_3, %c0_4] : memref<8x1xf32, #tpu.memory_space<vmem>>, vector<8x1xf32>
    %4 = vector.broadcast %3 : vector<8x1xf32> to vector<8x2048xf32>
    %5 = arith.addf %2, %4 : vector<8x2048xf32>
    %cst_5 = arith.constant dense<0.000000e+00> : vector<8xf32>
    %6 = vector.multi_reduction <add>, %5, %cst_5 [1] : vector<8x2048xf32> to vector<8xf32>
    %7 = vector.shape_cast %6 : vector<8xf32> to vector<8x1xf32>
    %cst_6 = arith.constant 2.048000e+03 : f32
    %8 = vector.broadcast %cst_6 : f32 to vector<8x1xf32>
    %9 = arith.divf %7, %8 : vector<8x1xf32>
    %10 = vector.broadcast %9 : vector<8x1xf32> to vector<8x2048xf32>
    %11 = arith.subf %5, %10 : vector<8x2048xf32>
    %12 = arith.mulf %11, %11 : vector<8x2048xf32>
    %cst_7 = arith.constant dense<0.000000e+00> : vector<8xf32>
    %13 = vector.multi_reduction <add>, %12, %cst_7 [1] : vector<8x2048xf32> to vector<8xf32>
    %14 = vector.shape_cast %13 : vector<8xf32> to vector<8x1xf32>
    %cst_8 = arith.constant 2.048000e+03 : f32
    %15 = vector.broadcast %cst_8 : f32 to vector<8x1xf32>
    %16 = arith.divf %14, %15 : vector<8x1xf32>
    %c0_9 = arith.constant 0 : index
    %c0_10 = arith.constant 0 : index
    %17 = vector.load %arg4[%c0_9, %c0_10] : memref<8x1xf32, #tpu.memory_space<vmem>>, vector<8x1xf32>
    %cst_11 = arith.constant 9.99999974E-6 : f32
    %18 = vector.broadcast %cst_11 : f32 to vector<8x1xf32>
    %19 = arith.addf %16, %18 : vector<8x1xf32>
    %20 = math.rsqrt %19 : vector<8x1xf32>
    %21 = arith.mulf %17, %20 : vector<8x1xf32>
    %c0_12 = arith.constant 0 : index
    %c0_13 = arith.constant 0 : index
    %22 = vector.load %arg5[%c0_12, %c0_13] : memref<8x1xf32, #tpu.memory_space<vmem>>, vector<8x1xf32>
    %23 = arith.mulf %9, %21 : vector<8x1xf32>
    %24 = arith.subf %22, %23 : vector<8x1xf32>
    %25 = vector.broadcast %21 : vector<8x1xf32> to vector<8x2048xf32>
    %26 = arith.mulf %5, %25 : vector<8x2048xf32>
    %27 = vector.broadcast %24 : vector<8x1xf32> to vector<8x2048xf32>
    %28 = arith.addf %26, %27 : vector<8x2048xf32>
    %cst_14 = arith.constant 0.000000e+00 : f32
    %29 = vector.broadcast %cst_14 : f32 to vector<8x2048xf32>
    %30 = arith.cmpf oge, %28, %29 : vector<8x2048xf32>
    %cst_15 = arith.constant 0.00999999977 : f32
    %31 = vector.broadcast %cst_15 : f32 to vector<8x2048xf32>
    %32 = arith.mulf %31, %28 : vector<8x2048xf32>
    %33 = arith.select %30, %28, %32 : vector<8x2048xi1>, vector<8x2048xf32>
    %34 = arith.truncf %33 : vector<8x2048xf32> to vector<8x2048xbf16>
    %c0_16 = arith.constant 0 : index
    %c0_17 = arith.constant 0 : index
    %35 = vector.load %arg6[%c0_16, %c0_17] : memref<8x2048xbf16, #tpu.memory_space<vmem>>, vector<8x2048xbf16>
    tpu.vector_store %arg6[%c0_16, %c0_17], %34 {strides = array<i32>} : memref<8x2048xbf16, #tpu.memory_space<vmem>>, vector<8x2048xbf16>,
    return
  }
  func.func @transform_0(%arg0: i32) -> (i32, i32) {
    %c0_i32 = arith.constant 0 : i32
    %c0_i32_0 = arith.constant 0 : i32
    %c0_i32_1 = arith.constant 0 : i32
    return %c0_i32, %c0_i32_0 : i32, i32
  }
  func.func @transform_1(%arg0: i32) -> (i32, i32) {
    %c0_i32 = arith.constant 0 : i32
    %c0_i32_0 = arith.constant 0 : i32
    %c0_i32_1 = arith.constant 0 : i32
    return %c0_i32, %c0_i32_0 : i32, i32
  }
  func.func @transform_2(%arg0: i32) -> (i32, i32) {
    %c0_i32 = arith.constant 0 : i32
    %c0_i32_0 = arith.constant 0 : i32
    %c0_i32_1 = arith.constant 0 : i32
    return %c0_i32, %c0_i32_0 : i32, i32
  }
  func.func @transform_3(%arg0: i32) -> (i32, i32) {
    %c0_i32 = arith.constant 0 : i32
    %c0_i32_0 = arith.constant 0 : i32
    %c0_i32_1 = arith.constant 0 : i32
    return %c0_i32, %c0_i32_0 : i32, i32
  }
  func.func @transform_4(%arg0: i32) -> (i32, i32) {
    %c0_i32 = arith.constant 0 : i32
    %c0_i32_0 = arith.constant 0 : i32
    %c0_i32_1 = arith.constant 0 : i32
    return %c0_i32, %c0_i32_0 : i32, i32
  }
  func.func @transform_5(%arg0: i32) -> (i32, i32) {
    %c0_i32 = arith.constant 0 : i32
    %c0_i32_0 = arith.constant 0 : i32
    %c0_i32_1 = arith.constant 0 : i32
    return %c0_i32, %c0_i32_0 : i32, i32
  }
}

module attributes {stable_mosaic.version = 11 : i64} {
  func.func @_conv_bias_kernel(%arg0: i32, %arg1: memref<72x2048xbf16, #tpu.memory_space<vmem>>, %arg2: memref<1x72xbf16, #tpu.memory_space<vmem>>, %arg3: memref<1x1xf32, #tpu.memory_space<vmem>>, %arg4: memref<1x2048xf32, #tpu.memory_space<vmem>>) attributes {dimension_semantics = [#tpu.dimension_semantics<arbitrary>], iteration_bounds = array<i64: 1>, scalar_prefetch = 0 : i64, scratch_operands = 0 : i64, tpu.core_type = #tpu.core_type<tc>, window_params = [{pipeline_mode = #tpu.pipeline_mode<synchronous>, transform_indices = @transform_0, window_bounds = array<i64: 72, 2048>}, {pipeline_mode = #tpu.pipeline_mode<synchronous>, transform_indices = @transform_1, window_bounds = array<i64: 1, 72>}, {pipeline_mode = #tpu.pipeline_mode<synchronous>, transform_indices = @transform_2, window_bounds = array<i64: 1, 1>}, {pipeline_mode = #tpu.pipeline_mode<synchronous>, transform_indices = @transform_3, window_bounds = array<i64: 1, 2048>}]} {
    %c0 = arith.constant 0 : index
    %c0_0 = arith.constant 0 : index
    %0 = vector.load %arg2[%c0, %c0_0] : memref<1x72xbf16, #tpu.memory_space<vmem>>, vector<1x72xbf16>
    %c0_1 = arith.constant 0 : index
    %c0_2 = arith.constant 0 : index
    %1 = vector.load %arg1[%c0_1, %c0_2] : memref<72x2048xbf16, #tpu.memory_space<vmem>>, vector<72x2048xbf16>
    %cst = arith.constant dense<0.000000e+00> : vector<1x2048xf32>
    %2 = tpu.matmul %0, %1, %cst {dimension_numbers = #tpu.dot_dimension_numbers<[1], [0], [0], [1], [0, 0, 1, 1], [], []>} : vector<1x72xbf16>, vector<72x2048xbf16>, vector<1x2048xf32> -> vector<1x2048xf32>
    %c0_3 = arith.constant 0 : index
    %c0_4 = arith.constant 0 : index
    %3 = vector.load %arg3[%c0_3, %c0_4] : memref<1x1xf32, #tpu.memory_space<vmem>>, vector<1x1xf32>
    %4 = vector.broadcast %3 : vector<1x1xf32> to vector<1x2048xf32>
    %5 = arith.addf %2, %4 : vector<1x2048xf32>
    %c0_5 = arith.constant 0 : index
    %c0_6 = arith.constant 0 : index
    %6 = vector.load %arg4[%c0_5, %c0_6] : memref<1x2048xf32, #tpu.memory_space<vmem>>, vector<1x2048xf32>
    tpu.vector_store %arg4[%c0_5, %c0_6], %5 {strides = array<i32>} : memref<1x2048xf32, #tpu.memory_space<vmem>>, vector<1x2048xf32>,
    return
  }
  func.func @transform_0(%arg0: i32) -> (i32, i32) {
    %c0_i32 = arith.constant 0 : i32
    %c0_i32_0 = arith.constant 0 : i32
    %c0_i32_1 = arith.constant 0 : i32
    return %c0_i32, %c0_i32_0 : i32, i32
  }
  func.func @transform_1(%arg0: i32) -> (i32, i32) {
    %c0_i32 = arith.constant 0 : i32
    %c0_i32_0 = arith.constant 0 : i32
    %c0_i32_1 = arith.constant 0 : i32
    return %c0_i32, %c0_i32_0 : i32, i32
  }
  func.func @transform_2(%arg0: i32) -> (i32, i32) {
    %c0_i32 = arith.constant 0 : i32
    %c0_i32_0 = arith.constant 0 : i32
    %c0_i32_1 = arith.constant 0 : i32
    return %c0_i32, %c0_i32_0 : i32, i32
  }
  func.func @transform_3(%arg0: i32) -> (i32, i32) {
    %c0_i32 = arith.constant 0 : i32
    %c0_i32_0 = arith.constant 0 : i32
    %c0_i32_1 = arith.constant 0 : i32
    return %c0_i32, %c0_i32_0 : i32, i32
  }
}

</mosaic_0001>

<bundles_post_ra>
// kernel: _lambda_.5
= control target key start
LH: loop header
LB: loop body
LE: loop exit
PB: predicated region body
PF: predicated region fallthrough
CT: control target
= control target key end

     0   :  { %10 = vsyncpa [#allocation3], 0  ;;  %s654_s0 = inlined_call_operand.vmem [shape: bf16[288,32], index: 0, kind: input, shape index: {}]   ;;  %s655_s1 = inlined_call_operand.hbm [shape: bf16[16,288], index: 1, kind: input, shape index: {}]   ;;  %s656_s2 = inlined_call_operand.hbm [shape: f32[16,1], index: 2, kind: input, shape index: {}]   ;;  %s657_s3 = inlined_call_operand.vmem [shape: f32[16,1], index: 3, kind: input, shape index: {}]   ;;  %s658_s4 = inlined_call_operand.vmem [shape: f32[16,1], index: 4, kind: input, shape index: {}]   ;;  %s659_s5 = inlined_call_operand.vmem [shape: bf16[16,32], index: 5, kind: output, shape index: {}]  }
   0x1   :  { %11 = vsyncpa [#allocation5], 0  ;;  %s532_s18 = smov [#allocation2]  }
   0x2   :  { %s19_s19 = sshll.u32 %s532_s18, 4  ;;  %s20_s19 = int_to_ptr.vmem [resolvable:$true] %s19_s19 }
   0x3   :  { %s496_s20 = scalar_lea.vmem %s20_s19, 384  ;;  %p501_p1 = scmp.lt.s32.totalorder %s20_s19, %s20_s19 }
   0x4   :  { %p497_p0 = scmp.ne.s32.totalorder %s20_s19, %s496_s20  ;;  %p502_p2 = scmp.lt.s32.totalorder %s496_s20, %s496_s20 }
   0x6   :  { %p503_p3 = por %p502_p2, %p501_p1 }
   0x8   :  { %p504_p4 = pnand %p503_p3, %p497_p0 }
   0xa   :  { %507 = shalt.err (!%p504_p4)
}
   0xb   :  { %s533_s21 = smov 192   ;;  %s534_s22 = smov 12  }
   0xc   :  { %25 = dma.hbm_to_vmem [thread:$0]  %s655_s1, 384, %s20_s19, [#allocation3], %s533_s21, %s533_s21, %s534_s22  }
   0xd   :  { %s535_s25 = smov [#allocation4]  }
   0xe   :  { %s31_s26 = sshll.u32 %s535_s25, 4  ;;  %s32_s26 = int_to_ptr.vmem [resolvable:$true] %s31_s26 }
   0xf   :  { %s516_s27 = scalar_lea.vmem %s32_s26, 256  ;;  %p521_p6 = scmp.lt.s32.totalorder %s32_s26, %s32_s26 }
  0x10   :  { %p517_p5 = scmp.ne.s32.totalorder %s32_s26, %s516_s27  ;;  %p522_p7 = scmp.lt.s32.totalorder %s516_s27, %s516_s27 }
  0x12   :  { %p523_p8 = por %p522_p7, %p521_p6 }
  0x14   :  { %p524_p9 = pnand %p523_p8, %p517_p5 }
  0x16   :  { %527 = shalt.err (!%p524_p9)
}
  0x17   :  { %s536_s28 = smov 128   ;;  %s537_s29 = smov 8  }
  0x18   :  { %37 = dma.hbm_to_vmem [thread:$0]  %s656_s2, 256, %s32_s26, [#allocation5], %s536_s28, %s536_s28, %s537_s29  }
  0x19   :  { %528 = dma.done.wait [#allocation3], 384  }
  0x1a   :  { %529 = vsyncadd [#allocation3], 4294966912 }
  0x1b   :  { %530 = dma.done.wait [#allocation5], 256  }
  0x1c   :  { %531 = vsyncadd [#allocation5], 4294967040  ;;  %v538_v0 = vmov 0.0   ;;  %vm539_vm0 = vmmov 0   ;;  %v540_v1 = vmov 0   ;;  %v462_v2 = vld [vmem:[%s654_s0 + $0x78] sm:$0xff]  }
  0x1d   :  { %443 = vmatprep.subr.bf16.mxu1 %v538_v0  ;;  %447 = vmatprep.mubr.msk.bf16.mxu1 %vm539_vm0, %v538_v0  ;;  %v463_v3 = vld [vmem:[%s654_s0 + $0x38] sm:$0xff]   ;;  %v464_v4 = vld [vmem:[%s654_s0 + $0x70] sm:$0xff]   ;;  %v466_v6 = vld [vmem:[%s654_s0 + $0x68] sm:$0xff]   ;;  %vm224_vm1 = vcmask 261120   ;;  %vm383_vm3 = vcmask 257024  }
  0x1e   :  { %460 = vset.pattern.permute.xlu0 %v540_v1  ;;  %461 = vset.pattern.permute.xlu1 %v540_v1  ;;  %v465_v5 = vld [vmem:[%s654_s0 + $0x30] sm:$0xff]   ;;  %v467_v7 = vld [vmem:[%s654_s0 + $0x28] sm:$0xff]   ;;  %v468_v8 = vld [vmem:[%s654_s0 + $0x60] sm:$0xff]  }
  0x1f   :  { %418 = vmatprep.subr.bf16.mxu0 %v462_v2  ;;  %v469_v9 = vld [vmem:[%s654_s0 + $0x20] sm:$0xff]   ;;  %v470_v10 = vld [vmem:[%s654_s0 + $0x58] sm:$0xff]   ;;  %v476_v11 = vld [vmem:[%s654_s0 + $0x88] sm:$0xff]  }
  0x20   :  { %419 = vmatpush3.bf16.msra.mxu0 %v463_v3  ;;  %v471_v12 = vld [vmem:[%s654_s0 + $0x18] sm:$0xff]   ;;  %v472_v13 = vld [vmem:[%s654_s0 + $0x50] sm:$0xff]   ;;  %444 = vmatpush3.bf16.msra.mxu1 %v476_v11  ;;  %v479_v14 = vld [vmem:[%s654_s0 + $0x80] sm:$0xff]  }
  0x21   :  { %420 = vmatprep.subr.bf16.mxu0 %v464_v4  ;;  %445 = vmatprep.subr.bf16.mxu1 %v538_v0  ;;  %v473_v15 = vld [vmem:[%s654_s0 + $0x10] sm:$0xff]   ;;  %v474_v17 = vld [vmem:[%s654_s0 + $0x48] sm:$0xff]   ;;  %v89_v19 = vld [vmem:[#allocation4] sm:$0xff] }
  0x22   :  { %v482_v16 = vld [vmem:[#allocation2 + $0x4] ss:$12 sps:$4 sm:$0xff]   ;;  %v483_v18 = vld [vmem:[#allocation2 + $0x8] ss:$12 sps:$4 sm:$0xff]   ;;  %93 = vperm.xlu0 %460, %v89_v19   ;;  %v480_v24 = vld [vmem:[#allocation2] ss:$12 sps:$4 sm:$0xff]  }
  0x23   :  { %260 = vmatprep.mubr.bf16.mxu0 %v482_v16  ;;  %v90_v20 = vld [vmem:[#allocation4 + $0x8] sm:$0xff]  ;;  %v475_v21 = vld [vmem:[%s654_s0 + $0x8] sm:$0xff]  }
  0x24   :  { %421 = vmatpush3.bf16.msra.mxu0 %v465_v5  ;;  %446 = vmatpush3.bf16.msra.mxu1 %v479_v14  ;;  %v477_v22 = vld [vmem:[%s654_s0 + $0x40] sm:$0xff]   ;;  %v332_v62 = vld [vmem:[%s657_s3 + $0x8] sm:$0xff] }
  0x25   :  { %422 = vmatprep.subr.bf16.mxu0 %v466_v6  ;;  %v478_v23 = vld [vmem:[%s654_s0] sm:$0xff]   ;;  %v340_v5 = vld [vmem:[%s658_s4 + $0x8] sm:$0xff] }
  0x26   :  { %98 = vperm.xlu0 %460, %v90_v20   ;;  %v331_v59 = vld [vmem:[%s657_s3] sm:$0xff] }
  0x27   :  { %448 = vmatmul.mubr.msk.bf16.vlgmr.msra.gmra.mxu1 %vm224_vm1, %v483_v18  ;;  %v339_v2 = vld [vmem:[%s658_s4] sm:$0xff] }
  0x28   :  { %423 = vmatpush3.bf16.msra.mxu0 %v467_v7 }
  0x29   :  { %424 = vmatprep.subr.bf16.mxu0 %v468_v8 }
  0x2c   :  { %425 = vmatpush3.bf16.msra.mxu0 %v469_v9 }
  0x2d   :  { %426 = vmatprep.subr.bf16.mxu0 %v470_v10 }
  0x30   :  { %427 = vmatpush3.bf16.msra.mxu0 %v471_v12 }
  0x31   :  { %428 = vmatprep.subr.bf16.mxu0 %v472_v13 }
  0x34   :  { %429 = vmatpush3.bf16.msra.mxu0 %v473_v15 }
  0x35   :  { %430 = vmatprep.subr.bf16.mxu0 %v474_v17 }
  0x38   :  { %431 = vmatpush3.bf16.msra.mxu0 %v475_v21 }
  0x39   :  { %432 = vmatprep.subr.bf16.mxu0 %v477_v22 }
  0x3c   :  { %433 = vmatpush3.bf16.msra.mxu0 %v478_v23 }
  0x3f   :  { %261 = vmatmul.mubr.bf16.vlgmr.msra.gmra.mxu0 %v480_v24 }
  0x9d   :  { %v94_v30 = vpop.permute.xlu0 %93 }
  0xa1   :  { %v99_v38 = vpop.permute.xlu0 %98 }
  0xe7   :  { %v303_v25 = vpop.f32.mrf.mxu1 }
  0xe9   :  { %v449_v26 = vpop.f32.mrf.mxu1 }
  0xeb   :  { %v306_v27 = vpop.f32.mrf.mxu1 }
  0xed   :  { %v450_v28 = vpop.f32.mrf.mxu1 }
  0xff   :  { %v434_v29 = vpop.f32.mrf.mxu0 }
 0x101   :  { %v435_v31 = vpop.f32.mrf.mxu0 }
 0x102   :  { %v436_v32 = vadd.f32 %v435_v31, %v434_v29 }
 0x103   :  { %v437_v33 = vpop.f32.mrf.mxu0 }
 0x104   :  { %v263_v34 = vadd.f32 %v436_v32, %v94_v30 }
 0x105   :  { %v438_v35 = vpop.f32.mrf.mxu0 }
 0x106   :  { %v439_v36 = vadd.f32 %v438_v35, %v437_v33  ;;  %v304_v37 = vadd.f32 %v303_v25, %v263_v34 }
 0x108   :  { %v266_v39 = vadd.f32 %v439_v36, %v99_v38  ;;  %v310_v40 = vsel %vm224_vm1, %v304_v37, 0.0 }
 0x109   :  { %311 = vadd.xlane.f32.xlu1 %v310_v40 }
 0x10a   :  { %v307_v41 = vadd.f32 %v306_v27, %v266_v39 }
 0x10c   :  { %v313_v42 = vsel %vm224_vm1, %v307_v41, 0.0 }
 0x10d   :  { %314 = vadd.xlane.f32.xlu1 %v313_v42 }
 0x192   :  { %v312_v43 = vpop.xlane.xlu1 %311 }
 0x193   :  { %v317_v44 = vmul.f32 0.03125, %v312_v43 }
 0x195   :  { %v319_v45 = vsub.f32 %v304_v37, %v317_v44 }
 0x196   :  { %v315_v46 = vpop.xlane.xlu1 %314 }
 0x197   :  { %v318_v47 = vmul.f32 0.03125, %v315_v46  ;;  %v321_v48 = vmul.f32 %v319_v45, %v319_v45 }
 0x199   :  { %v320_v49 = vsub.f32 %v307_v41, %v318_v47  ;;  %v323_v50 = vsel %vm224_vm1, %v321_v48, 0.0 }
 0x19a   :  { %324 = vadd.xlane.f32.xlu0 %v323_v50 }
 0x19b   :  { %v322_v51 = vmul.f32 %v320_v49, %v320_v49 }
 0x19d   :  { %v326_v52 = vsel %vm224_vm1, %v322_v51, 0.0 }
 0x19e   :  { %327 = vadd.xlane.f32.xlu1 %v326_v52 }
 0x223   :  { %v325_v53 = vpop.xlane.xlu0 %324 }
 0x224   :  { %v329_v54 = vmul.f32 0.03125, %v325_v53 }
 0x226   :  { %v333_v55 = vadd.f32 1e-05, %v329_v54 }
 0x227   :  { %v328_v56 = vpop.xlane.xlu1 %327 }
 0x228   :  { %484 = vrsqrt.f32 %v333_v55  ;;  %v330_v57 = vmul.f32 0.03125, %v328_v56 }
 0x22a   :  { %v334_v58 = vadd.f32 1e-05, %v330_v57 }
 0x22c   :  { %486 = vrsqrt.f32 %v334_v58 }
 0x235   :  { %v485_v60 = vpop.eup %484 }
 0x236   :  { %v337_v61 = vmul.f32 %v485_v60, %v331_v59 }
 0x238   :  { %347 = vperm.xlu1 %461, %v337_v61   ;;  %v341_v1 = vmul.f32 %v337_v61, %v317_v44 }
 0x239   :  { %v487_v63 = vpop.eup %486 }
 0x23a   :  { %v338_v0 = vmul.f32 %v487_v63, %v332_v62  ;;  %v343_v3 = vsub.f32 %v339_v2, %v341_v1 }
 0x23c   :  { %352 = vperm.xlu1 %461, %v338_v0   ;;  %v342_v4 = vmul.f32 %v338_v0, %v318_v47 }
 0x23e   :  { %v344_v6 = vsub.f32 %v340_v5, %v342_v4 }
 0x240   :  { %359 = vperm.xlu1 %461, %v343_v3  }
 0x244   :  { %364 = vperm.xlu1 %461, %v344_v6  }
 0x2b3   :  { %v348_v7 = vpop.permute.xlu1 %347 }
 0x2b4   :  { %v355_v9 = vmul.f32 %v348_v7, %v304_v37 }
 0x2b7   :  { %v353_v8 = vpop.permute.xlu1 %352 }
 0x2b8   :  { %v356_v12 = vmul.f32 %v353_v8, %v307_v41 }
 0x2bb   :  { %v360_v10 = vpop.permute.xlu1 %359 }
 0x2bc   :  { %v367_v11 = vadd.f32 %v360_v10, %v355_v9 }
 0x2be   :  { %vm369_vm2 = vcmp.ge.f32.partialorder %v367_v11, 0.0  ;;  %v371_v13 = vmul.f32 0.01, %v367_v11 }
 0x2bf   :  { %v365_v14 = vpop.permute.xlu1 %364 }
 0x2c0   :  { %v373_v15 = vsel %vm369_vm2, %v367_v11, %v371_v13  ;;  %v368_v16 = vadd.f32 %v365_v14, %v356_v12 }
 0x2c1   :  { %v416_v17 = vpack.c.bf16 %v373_v15, %v373_v15 }
 0x2c2   :  { %vm370_vm4 = vcmp.ge.f32.partialorder %v368_v16, 0.0  ;;  %v372_v18 = vmul.f32 0.01, %v368_v16 }
 0x2c3   :  { %384 = vst.msk [vmem:[%s659_s5] sm:$0xf] %vm383_vm3, %v416_v17 }
 0x2c4   :  { %v374_v19 = vsel %vm370_vm4, %v368_v16, %v372_v18 }
 0x2c5   :  { %v417_v20 = vpack.c.bf16 %v374_v19, %v374_v19 }
 0x2c7   :  { %385 = vst.msk [vmem:[%s659_s5 + $0x4] sm:$0xf] %vm383_vm3, %v417_v20 }
 0x2c8   :  { %390 = vsyncpa [#allocation3], 1 }
 0x2c9   :  { %391 = vsyncpa [#allocation5], 1 }

// kernel: _lambda_.6
= control target key start
LH: loop header
LB: loop body
LE: loop exit
PB: predicated region body
PF: predicated region fallthrough
CT: control target
= control target key end

     0   :  { %v215_v0 = vmov 0   ;;  %vm106_vm0 = vcmask 130048   ;;  %s288_s0 = inlined_call_operand.vmem [shape: bf16[144,128], index: 0, kind: input, shape index: {}]   ;;  %s289_s1 = inlined_call_operand.vmem [shape: bf16[8,144], index: 1, kind: input, shape index: {}]   ;;  %s290_s2 = inlined_call_operand.vmem [shape: f32[8,1], index: 2, kind: input, shape index: {}]   ;;  %s291_s3 = inlined_call_operand.vmem [shape: f32[8,1], index: 3, kind: input, shape index: {}]   ;;  %s292_s4 = inlined_call_operand.vmem [shape: f32[8,1], index: 4, kind: input, shape index: {}]   ;;  %s293_s5 = inlined_call_operand.vmem [shape: bf16[8,128], index: 5, kind: output, shape index: {}]  }
   0x1   :  { %110 = vmatprep.subr.bf16.mxu0 %v215_v0  ;;  %v202_v1 = vld [vmem:[%s288_s0 + $0x38] sm:$0xff]   ;;  %200 = vset.pattern.permute.xlu0 %v215_v0  ;;  %v203_v2 = vld [vmem:[%s288_s0 + $0x30] sm:$0xff]   ;;  %v204_v3 = vld [vmem:[%s288_s0 + $0x28] sm:$0xff]  }
   0x2   :  { %201 = vset.pattern.permute.xlu1 %v215_v0  ;;  %111 = vmatpush1.bf16.msra.mxu0 %v202_v1  ;;  %v21_v4 = vld [vmem:[%s289_s1] sm:$0xff]  ;;  %v206_v8 = vld [vmem:[%s288_s0 + $0x18] sm:$0xff]   ;;  %v207_v9 = vld [vmem:[%s288_s0 + $0x10] sm:$0xff]  }
   0x3   :  { %112 = vmatprep.subr.bf16.mxu0 %v215_v0  ;;  %v40_v5 = vld [vmem:[%s290_s2] sm:$0xff]  ;;  %v188_v7 = vcombine.high %v21_v4, %v21_v4  ;;  %v208_v10 = vld [vmem:[%s288_s0 + $0x8] sm:$0xff]   ;;  %v187_v13 = vcombine.low %v21_v4, %v21_v4 }
   0x4   :  { %v205_v6 = vld [vmem:[%s288_s0 + $0x20] sm:$0xff]   ;;  %43 = vperm.xlu0 %200, %v40_v5  }
   0x5   :  { %198 = vmatprep.mubr.msk.bf16.mxu0 %vm106_vm0, %v188_v7  ;;  %v209_v11 = vld [vmem:[%s288_s0] sm:$0xff]  }
   0x6   :  { %113 = vmatpush1.bf16.msra.mxu0 %v203_v2  ;;  %v210_v12 = vld [vmem:[%s288_s0 + $0x40] sm:$0xff]  }
   0x7   :  { %114 = vmatprep.subr.bf16.mxu0 %v215_v0  ;;  %v159_v27 = vld [vmem:[%s291_s3] sm:$0xff] }
   0x8   :  { %v163_v30 = vld [vmem:[%s292_s4] sm:$0xff] }
   0xa   :  { %115 = vmatpush1.bf16.msra.mxu0 %v204_v3 }
   0xb   :  { %116 = vmatprep.subr.bf16.mxu0 %v215_v0 }
   0xe   :  { %117 = vmatpush1.bf16.msra.mxu0 %v205_v6 }
   0xf   :  { %118 = vmatprep.subr.bf16.mxu0 %v215_v0 }
  0x12   :  { %119 = vmatpush1.bf16.msra.mxu0 %v206_v8 }
  0x13   :  { %120 = vmatprep.subr.bf16.mxu0 %v215_v0 }
  0x16   :  { %121 = vmatpush1.bf16.msra.mxu0 %v207_v9 }
  0x17   :  { %122 = vmatprep.subr.bf16.mxu0 %v215_v0 }
  0x1a   :  { %123 = vmatpush1.bf16.msra.mxu0 %v208_v10 }
  0x1b   :  { %124 = vmatprep.subr.bf16.mxu0 %v215_v0 }
  0x1e   :  { %125 = vmatpush1.bf16.msra.mxu0 %v209_v11 }
  0x1f   :  { %140 = vmatprep.subr.bf16.mxu0 %v215_v0 }
  0x22   :  { %141 = vmatpush2.bf16.msra.mxu0 %v210_v12 }
  0x25   :  { %143 = vmatmul.mubr.bf16.vlgmr.msra.gmra.mxu0 %v187_v13 }
  0x7f   :  { %v44_v14 = vpop.permute.xlu0 %43 }
  0xe5   :  { %v144_v15 = vpop.f32.mrf.mxu0 }
  0xe6   :  { %v145_v16 = vadd.f32 %v144_v15, %v44_v14 }
  0xe7   :  { %v146_v17 = vpop.f32.mrf.mxu0 }
  0xe8   :  { %150 = vadd.xlane.f32.xlu0 %v145_v16 }
  0xe9   :  { %v147_v18 = vpop.f32.mrf.mxu0 }
  0xeb   :  { %v148_v19 = vpop.f32.mrf.mxu0 }
 0x171   :  { %v151_v20 = vpop.xlane.xlu0 %150 }
 0x172   :  { %v153_v21 = vmul.f32 0.0078125, %v151_v20 }
 0x174   :  { %v154_v22 = vsub.f32 %v145_v16, %v153_v21 }
 0x176   :  { %v155_v23 = vmul.f32 %v154_v22, %v154_v22 }
 0x178   :  { %156 = vadd.xlane.f32.xlu1 %v155_v23 }
 0x201   :  { %v157_v24 = vpop.xlane.xlu1 %156 }
 0x202   :  { %v158_v25 = vmul.f32 0.0078125, %v157_v24 }
 0x204   :  { %v160_v26 = vadd.f32 1e-05, %v158_v25 }
 0x206   :  { %213 = vrsqrt.f32 %v160_v26 }
 0x213   :  { %v214_v28 = vpop.eup %213 }
 0x214   :  { %v162_v29 = vmul.f32 %v214_v28, %v159_v27 }
 0x216   :  { %168 = vperm.xlu1 %201, %v162_v29   ;;  %v164_v31 = vmul.f32 %v162_v29, %v153_v21 }
 0x218   :  { %v165_v32 = vsub.f32 %v163_v30, %v164_v31 }
 0x21a   :  { %174 = vperm.xlu1 %201, %v165_v32  }
 0x291   :  { %v169_v33 = vpop.permute.xlu1 %168 }
 0x292   :  { %v171_v34 = vmul.f32 %v169_v33, %v145_v16 }
 0x295   :  { %v175_v35 = vpop.permute.xlu1 %174 }
 0x296   :  { %v177_v36 = vadd.f32 %v175_v35, %v171_v34 }
 0x298   :  { %vm178_vm1 = vcmp.ge.f32.partialorder %v177_v36, 0.0  ;;  %v179_v37 = vmul.f32 0.01, %v177_v36 }
 0x29a   :  { %v180_v38 = vsel %vm178_vm1, %v177_v36, %v179_v37 }
 0x29b   :  { %v181_v39 = vpack.c.bf16 %v180_v38, %v180_v38 }
 0x29d   :  { %182 = vst [vmem:[%s293_s5] sm:$0xf] %v181_v39 }

// kernel: _lambda_.7
= control target key start
LH: loop header
LB: loop body
LE: loop exit
PB: predicated region body
PF: predicated region fallthrough
CT: control target
= control target key end

     0   :  { %vm140_vm0 = vcmask 1043456   ;;  %v376_v2 = vmov 0   ;;  %vm136_vm1 = vcmask 588800   ;;  %s483_s0 = inlined_call_operand.vmem [shape: bf16[72,512], index: 0, kind: input, shape index: {}]   ;;  %s484_s2 = inlined_call_operand.vmem [shape: f32[8,1], index: 2, kind: input, shape index: {}]   ;;  %s485_s1 = inlined_call_operand.vmem [shape: bf16[8,72], index: 1, kind: input, shape index: {}]   ;;  %s486_s3 = inlined_call_operand.vmem [shape: f32[8,1], index: 3, kind: input, shape index: {}]   ;;  %s487_s4 = inlined_call_operand.vmem [shape: f32[8,1], index: 4, kind: input, shape index: {}]   ;;  %s488_s5 = inlined_call_operand.vmem [shape: bf16[8,512], index: 5, kind: output, shape index: {}]  }
   0x1   :  { %v38_v0 = vld [vmem:[%s483_s0 + $0x80] sm:$0xff]  ;;  %v39_v1 = vld [vmem:[%s483_s0 + $0x88] sm:$0xff]  ;;  %185 = vmatprep.mubr.bf16.mxu0 %v376_v2  ;;  %226 = vmatprep.mubr.bf16.mxu1 %v376_v2 }
   0x2   :  { %v332_v3 = vcombine.high %v38_v0, %v38_v0  ;;  %v334_v4 = vcombine.high %v39_v1, %v39_v1  ;;  %v331_v5 = vcombine.low %v38_v0, %v38_v0  ;;  %v333_v6 = vcombine.low %v39_v1, %v39_v1  ;;  %v350_v7 = vld [vmem:[%s483_s0 + $0x64] ss:$16 sps:$4 sm:$0xff]   ;;  %344 = vset.pattern.permute.xlu0 %v376_v2  ;;  %v352_v8 = vld [vmem:[%s483_s0 + $0x6c] ss:$16 sps:$4 sm:$0xff]   ;;  %v354_v11 = vld [vmem:[%s483_s0 + $0x60] ss:$16 sps:$4 sm:$0xff]  }
   0x3   :  { %345 = vset.pattern.permute.xlu1 %v376_v2  ;;  %v355_v12 = vld [vmem:[%s483_s0 + $0x68] ss:$16 sps:$4 sm:$0xff]   ;;  %v356_v13 = vld [vmem:[%s483_s0 + $0x44] ss:$16 sps:$4 sm:$0xff]   ;;  %v358_v14 = vld [vmem:[%s483_s0 + $0x4c] ss:$16 sps:$4 sm:$0xff]  }
   0x4   :  { %335 = vmatprep.subr.msk.bf16.mxu0 %vm140_vm0, %v332_v3  ;;  %337 = vmatprep.subr.msk.bf16.mxu1 %vm140_vm0, %v334_v4  ;;  %v142_v9 = vsel %vm140_vm0, %v331_v5, 0  ;;  %v148_v10 = vsel %vm140_vm0, %v333_v6, 0  ;;  %v360_v15 = vld [vmem:[%s483_s0 + $0x40] ss:$16 sps:$4 sm:$0xff]   ;;  %v361_v16 = vld [vmem:[%s483_s0 + $0x48] ss:$16 sps:$4 sm:$0xff]  }
   0x5   :  { %160 = vmatpush1.bf16.msra.mxu0 %v142_v9  ;;  %201 = vmatpush1.bf16.msra.mxu1 %v148_v10  ;;  %v362_v17 = vld [vmem:[%s483_s0 + $0x24] ss:$16 sps:$4 sm:$0xff]   ;;  %v364_v18 = vld [vmem:[%s483_s0 + $0x2c] ss:$16 sps:$4 sm:$0xff]   ;;  %v366_v20 = vld [vmem:[%s483_s0 + $0x20] ss:$16 sps:$4 sm:$0xff]  }
   0x6   :  { %161 = vmatprep.subr.bf16.mxu0 %v350_v7  ;;  %202 = vmatprep.subr.bf16.mxu1 %v352_v8  ;;  %v40_v19 = vld [vmem:[%s484_s2] sm:$0xff]  ;;  %v367_v21 = vld [vmem:[%s483_s0 + $0x28] ss:$16 sps:$4 sm:$0xff]   ;;  %v370_v23 = vld [vmem:[%s483_s0 + $0xc] ss:$16 sps:$4 sm:$0xff]  }
   0x7   :  { %v368_v22 = vld [vmem:[%s483_s0 + $0x4] ss:$16 sps:$4 sm:$0xff]   ;;  %43 = vperm.xlu0 %344, %v40_v19   ;;  %v372_v24 = vld [vmem:[%s483_s0] ss:$16 sps:$4 sm:$0xff]   ;;  %v373_v25 = vld [vmem:[%s483_s0 + $0x8] ss:$16 sps:$4 sm:$0xff]  }
   0x8   :  { %v21_v26 = vld [vmem:[%s485_s1] sm:$0xf] }
   0x9   :  { %162 = vmatpush1.bf16.msra.mxu0 %v354_v11  ;;  %203 = vmatpush1.bf16.msra.mxu1 %v355_v12  ;;  %v256_v59 = vld [vmem:[%s486_s3] sm:$0xff] }
   0xa   :  { %163 = vmatprep.subr.bf16.mxu0 %v356_v13  ;;  %204 = vmatprep.subr.bf16.mxu1 %v358_v14  ;;  %v260_v62 = vld [vmem:[%s487_s4] sm:$0xff] }
   0xd   :  { %164 = vmatpush1.bf16.msra.mxu0 %v360_v15  ;;  %205 = vmatpush1.bf16.msra.mxu1 %v361_v16 }
   0xe   :  { %165 = vmatprep.subr.bf16.mxu0 %v362_v17  ;;  %206 = vmatprep.subr.bf16.mxu1 %v364_v18 }
  0x11   :  { %166 = vmatpush1.bf16.msra.mxu0 %v366_v20  ;;  %207 = vmatpush1.bf16.msra.mxu1 %v367_v21 }
  0x12   :  { %167 = vmatprep.subr.bf16.mxu0 %v368_v22  ;;  %208 = vmatprep.subr.bf16.mxu1 %v370_v23 }
  0x15   :  { %168 = vmatpush1.bf16.msra.mxu0 %v372_v24  ;;  %209 = vmatpush1.bf16.msra.mxu1 %v373_v25 }
  0x18   :  { %336 = vmatmul.mubr.msk.bf16.vlgmr.msra.gmra.mxu0 %vm136_vm1, %v21_v26  ;;  %338 = vmatmul.mubr.msk.bf16.vlgmr.msra.gmra.mxu1 %vm136_vm1, %v21_v26 }
  0x82   :  { %v44_v27 = vpop.permute.xlu0 %43 }
  0xd8   :  { %v187_v28 = vpop.f32.mrf.mxu0  ;;  %v228_v29 = vpop.f32.mrf.mxu1 }
  0xd9   :  { %v188_v32 = vadd.f32 %v187_v28, %v44_v27  ;;  %v229_v36 = vadd.f32 %v228_v29, %v44_v27 }
  0xda   :  { %v189_v30 = vpop.f32.mrf.mxu0  ;;  %v230_v31 = vpop.f32.mrf.mxu1 }
  0xdb   :  { %v190_v33 = vadd.f32 %v189_v30, %v44_v27  ;;  %v231_v40 = vadd.f32 %v230_v31, %v44_v27 }
  0xdc   :  { %v191_v34 = vpop.f32.mrf.mxu0  ;;  %v232_v35 = vpop.f32.mrf.mxu1 }
  0xdd   :  { %v235_v37 = vadd.f32 %v190_v33, %v188_v32 }
  0xde   :  { %v192_v38 = vpop.f32.mrf.mxu0  ;;  %v233_v39 = vpop.f32.mrf.mxu1 }
  0xdf   :  { %v236_v41 = vadd.f32 %v235_v37, %v229_v36 }
  0xe1   :  { %v237_v42 = vadd.f32 %v236_v41, %v231_v40 }
  0xe3   :  { %238 = vadd.xlane.f32.xlu0 %v237_v42 }
 0x16c   :  { %v239_v43 = vpop.xlane.xlu0 %238 }
 0x16d   :  { %v241_v44 = vmul.f32 0.001953125, %v239_v43 }
 0x16f   :  { %v242_v45 = vsub.f32 %v188_v32, %v241_v44  ;;  %v243_v46 = vsub.f32 %v190_v33, %v241_v44  ;;  %v244_v47 = vsub.f32 %v229_v36, %v241_v44  ;;  %v245_v48 = vsub.f32 %v231_v40, %v241_v44 }
 0x171   :  { %v246_v49 = vmul.f32 %v242_v45, %v242_v45  ;;  %v247_v50 = vmul.f32 %v243_v46, %v243_v46  ;;  %v248_v51 = vmul.f32 %v244_v47, %v244_v47  ;;  %v249_v53 = vmul.f32 %v245_v48, %v245_v48 }
 0x173   :  { %v250_v52 = vadd.f32 %v247_v50, %v246_v49 }
 0x175   :  { %v251_v54 = vadd.f32 %v250_v52, %v248_v51 }
 0x177   :  { %v252_v55 = vadd.f32 %v251_v54, %v249_v53 }
 0x179   :  { %253 = vadd.xlane.f32.xlu1 %v252_v55 }
 0x202   :  { %v254_v56 = vpop.xlane.xlu1 %253 }
 0x203   :  { %v255_v57 = vmul.f32 0.001953125, %v254_v56 }
 0x205   :  { %v257_v58 = vadd.f32 1e-05, %v255_v57 }
 0x207   :  { %374 = vrsqrt.f32 %v257_v58 }
 0x214   :  { %v375_v60 = vpop.eup %374 }
 0x215   :  { %v259_v61 = vmul.f32 %v375_v60, %v256_v59 }
 0x217   :  { %265 = vperm.xlu1 %345, %v259_v61   ;;  %v261_v63 = vmul.f32 %v259_v61, %v241_v44 }
 0x219   :  { %v262_v0 = vsub.f32 %v260_v62, %v261_v63 }
 0x21b   :  { %274 = vperm.xlu1 %345, %v262_v0  }
 0x292   :  { %v266_v1 = vpop.permute.xlu1 %265 }
 0x293   :  { %v268_v2 = vmul.f32 %v266_v1, %v188_v32  ;;  %v269_v3 = vmul.f32 %v266_v1, %v190_v33  ;;  %v270_v4 = vmul.f32 %v266_v1, %v229_v36  ;;  %v271_v5 = vmul.f32 %v266_v1, %v231_v40 }
 0x296   :  { %v275_v6 = vpop.permute.xlu1 %274 }
 0x297   :  { %v277_v7 = vadd.f32 %v275_v6, %v268_v2  ;;  %v278_v8 = vadd.f32 %v275_v6, %v269_v3  ;;  %v279_v9 = vadd.f32 %v275_v6, %v270_v4  ;;  %v280_v10 = vadd.f32 %v275_v6, %v271_v5 }
 0x299   :  { %vm281_vm2 = vcmp.ge.f32.partialorder %v277_v7, 0.0  ;;  %vm282_vm3 = vcmp.ge.f32.partialorder %v278_v8, 0.0  ;;  %vm283_vm4 = vcmp.ge.f32.partialorder %v279_v9, 0.0  ;;  %vm284_vm5 = vcmp.ge.f32.partialorder %v280_v10, 0.0 }
 0x29a   :  { %v285_v11 = vmul.f32 0.01, %v277_v7  ;;  %v286_v12 = vmul.f32 0.01, %v278_v8  ;;  %v287_v13 = vmul.f32 0.01, %v279_v9 }
 0x29b   :  { %v288_v14 = vmul.f32 0.01, %v280_v10 }
 0x29c   :  { %v289_v15 = vsel %vm281_vm2, %v277_v7, %v285_v11  ;;  %v290_v16 = vsel %vm282_vm3, %v278_v8, %v286_v12  ;;  %v291_v17 = vsel %vm283_vm4, %v279_v9, %v287_v13 }
 0x29d   :  { %v292_v18 = vsel %vm284_vm5, %v280_v10, %v288_v14  ;;  %v341_v19 = vpack.c.bf16 %v290_v16, %v289_v15 }
 0x29e   :  { %v342_v20 = vpack.c.bf16 %v292_v18, %v291_v17 }
 0x29f   :  { %309 = vst [vmem:[%s488_s5] sm:$0xff] %v341_v19 }
 0x2a0   :  { %310 = vst [vmem:[%s488_s5 + $0x8] sm:$0xff] %v342_v20 }

// kernel: _lambda_.8
= control target key start
LH: loop header
LB: loop body
LE: loop exit
PB: predicated region body
PF: predicated region fallthrough
CT: control target
= control target key end

     0   :  { %vm464_vm0 = vcmask 1043456   ;;  %v1216_v3 = vmov 0   ;;  %vm460_vm1 = vcmask 588800   ;;  %s1639_s0 = inlined_call_operand.vmem [shape: bf16[72,2048], index: 0, kind: input, shape index: {}]   ;;  %s1640_s1 = inlined_call_operand.vmem [shape: bf16[8,72], index: 1, kind: input, shape index: {}]   ;;  %s1641_s2 = inlined_call_operand.vmem [shape: f32[8,1], index: 2, kind: input, shape index: {}]   ;;  %s1642_s3 = inlined_call_operand.vmem [shape: f32[8,1], index: 3, kind: input, shape index: {}]   ;;  %s1643_s4 = inlined_call_operand.vmem [shape: f32[8,1], index: 4, kind: input, shape index: {}]   ;;  %s1644_s5 = inlined_call_operand.vmem [shape: bf16[8,2048], index: 5, kind: output, shape index: {}]  }
   0x1   :  { %v86_v0 = vld [vmem:[%s1639_s0 + $0x200] sm:$0xff]  ;;  %v87_v1 = vld [vmem:[%s1639_s0 + $0x208] sm:$0xff]  ;;  %545 = vmatprep.mubr.bf16.mxu0 %v1216_v3  ;;  %586 = vmatprep.mubr.bf16.mxu1 %v1216_v3  ;;  %v88_v39 = vld [vmem:[%s1639_s0 + $0x210] sm:$0xff] }
   0x2   :  { %v70_v2 = vld [vmem:[%s1639_s0 + $0x180] sm:$0xff]  ;;  %v1148_v4 = vcombine.high %v86_v0, %v86_v0  ;;  %v1150_v5 = vcombine.high %v87_v1, %v87_v1  ;;  %v1147_v6 = vcombine.low %v86_v0, %v86_v0  ;;  %v1149_v7 = vcombine.low %v87_v1, %v87_v1  ;;  %v71_v9 = vld [vmem:[%s1639_s0 + $0x188] sm:$0xff]  ;;  %1196 = vset.pattern.permute.xlu0 %v1216_v3  ;;  %v89_v40 = vld [vmem:[%s1639_s0 + $0x218] sm:$0xff] }
   0x3   :  { %v78_v8 = vld [vmem:[%s1639_s0 + $0x1c0] sm:$0xff]  ;;  %v79_v10 = vld [vmem:[%s1639_s0 + $0x1c8] sm:$0xff]  ;;  %1197 = vset.pattern.permute.xlu1 %v1216_v3  ;;  %v1152_v43 = vcombine.high %v88_v39, %v88_v39  ;;  %v1154_v44 = vcombine.high %v89_v40, %v89_v40  ;;  %v1151_v45 = vcombine.low %v88_v39, %v88_v39  ;;  %v1153_v46 = vcombine.low %v89_v40, %v89_v40  ;;  %v72_v47 = vld [vmem:[%s1639_s0 + $0x190] sm:$0xff] }
   0x4   :  { %v1132_v11 = vcombine.high %v70_v2, %v78_v8  ;;  %v1134_v12 = vcombine.high %v71_v9, %v79_v10  ;;  %v54_v13 = vld [vmem:[%s1639_s0 + $0x100] sm:$0xff]  ;;  %v55_v15 = vld [vmem:[%s1639_s0 + $0x108] sm:$0xff]  ;;  %1163 = vmatprep.subr.msk.bf16.mxu0 %vm464_vm0, %v1148_v4  ;;  %1165 = vmatprep.subr.msk.bf16.mxu1 %vm464_vm0, %v1150_v5  ;;  %v466_v16 = vsel %vm464_vm0, %v1147_v6, 0  ;;  %v472_v17 = vsel %vm464_vm0, %v1149_v7, 0  ;;  %v80_v48 = vld [vmem:[%s1639_s0 + $0x1d0] sm:$0xff] }
   0x5   :  { %v62_v14 = vld [vmem:[%s1639_s0 + $0x140] sm:$0xff]  ;;  %v63_v18 = vld [vmem:[%s1639_s0 + $0x148] sm:$0xff]  ;;  %520 = vmatpush1.bf16.msra.mxu0 %v466_v16  ;;  %561 = vmatpush1.bf16.msra.mxu1 %v472_v17  ;;  %v1131_v19 = vcombine.low %v70_v2, %v78_v8  ;;  %v1133_v20 = vcombine.low %v71_v9, %v79_v10  ;;  %v73_v49 = vld [vmem:[%s1639_s0 + $0x198] sm:$0xff]  ;;  %v478_v52 = vsel %vm464_vm0, %v1151_v45, 0  ;;  %v484_v53 = vsel %vm464_vm0, %v1153_v46, 0 }
   0x6   :  { %521 = vmatprep.subr.bf16.mxu0 %v1132_v11  ;;  %562 = vmatprep.subr.bf16.mxu1 %v1134_v12  ;;  %v1116_v21 = vcombine.high %v54_v13, %v62_v14  ;;  %v1118_v22 = vcombine.high %v55_v15, %v63_v18  ;;  %v38_v23 = vld [vmem:[%s1639_s0 + $0x80] sm:$0xff]  ;;  %v39_v25 = vld [vmem:[%s1639_s0 + $0x88] sm:$0xff]  ;;  %v1115_v27 = vcombine.low %v54_v13, %v62_v14  ;;  %v81_v50 = vld [vmem:[%s1639_s0 + $0x1d8] sm:$0xff] }
   0x7   :  { %v46_v24 = vld [vmem:[%s1639_s0 + $0xc0] sm:$0xff]  ;;  %v47_v26 = vld [vmem:[%s1639_s0 + $0xc8] sm:$0xff]  ;;  %v1117_v28 = vcombine.low %v55_v15, %v63_v18  ;;  %v1136_v54 = vcombine.high %v72_v47, %v80_v48  ;;  %v1138_v55 = vcombine.high %v73_v49, %v81_v50  ;;  %v56_v56 = vld [vmem:[%s1639_s0 + $0x110] sm:$0xff]  ;;  %v1135_v60 = vcombine.low %v72_v47, %v80_v48 }
   0x8   :  { %v1100_v29 = vcombine.high %v38_v23, %v46_v24  ;;  %v1102_v30 = vcombine.high %v39_v25, %v47_v26  ;;  %v22_v31 = vld [vmem:[%s1639_s0] sm:$0xff]  ;;  %v23_v33 = vld [vmem:[%s1639_s0 + $0x8] sm:$0xff]  ;;  %v1099_v35 = vcombine.low %v38_v23, %v46_v24  ;;  %v1101_v36 = vcombine.low %v39_v25, %v47_v26  ;;  %v64_v57 = vld [vmem:[%s1639_s0 + $0x150] sm:$0xff] }
   0x9   :  { %522 = vmatpush1.bf16.msra.mxu0 %v1131_v19  ;;  %563 = vmatpush1.bf16.msra.mxu1 %v1133_v20  ;;  %v30_v32 = vld [vmem:[%s1639_s0 + $0x40] sm:$0xff]  ;;  %v31_v34 = vld [vmem:[%s1639_s0 + $0x48] sm:$0xff]  ;;  %v57_v58 = vld [vmem:[%s1639_s0 + $0x118] sm:$0xff]  ;;  %v1137_v61 = vcombine.low %v73_v49, %v81_v50  ;;  %v1120_v63 = vcombine.high %v56_v56, %v64_v57  ;;  %v1119_v6 = vcombine.low %v56_v56, %v64_v57 }
   0xa   :  { %523 = vmatprep.subr.bf16.mxu0 %v1116_v21  ;;  %564 = vmatprep.subr.bf16.mxu1 %v1118_v22  ;;  %v1084_v37 = vcombine.high %v22_v31, %v30_v32  ;;  %v1086_v38 = vcombine.high %v23_v33, %v31_v34  ;;  %v1083_v41 = vcombine.low %v22_v31, %v30_v32  ;;  %v1330_v51 = vld [vmem:[%s1640_s1] sm:$0xf]  ;;  %v65_v59 = vld [vmem:[%s1639_s0 + $0x158] sm:$0xff]  ;;  %v40_v1 = vld [vmem:[%s1639_s0 + $0x90] sm:$0xff] }
   0xb   :  { %v1085_v42 = vcombine.low %v23_v33, %v31_v34  ;;  %v94_v62 = vld [vmem:[%s1641_s2] sm:$0xff]  ;;  %v1122_v0 = vcombine.high %v57_v58, %v65_v59  ;;  %v48_v2 = vld [vmem:[%s1639_s0 + $0xd0] sm:$0xff]  ;;  %v41_v4 = vld [vmem:[%s1639_s0 + $0x98] sm:$0xff]  ;;  %v1121_v7 = vcombine.low %v57_v58, %v65_v59 }
   0xc   :  { %v49_v5 = vld [vmem:[%s1639_s0 + $0xd8] sm:$0xff]  ;;  %97 = vperm.xlu0 %1196, %v94_v62   ;;  %v1104_v8 = vcombine.high %v40_v1, %v48_v2  ;;  %v24_v10 = vld [vmem:[%s1639_s0 + $0x10] sm:$0xff]  ;;  %v1103_v14 = vcombine.low %v40_v1, %v48_v2  ;;  %v90_v18 = vld [vmem:[%s1639_s0 + $0x220] sm:$0xff] }
   0xd   :  { %524 = vmatpush1.bf16.msra.mxu0 %v1115_v27  ;;  %565 = vmatpush1.bf16.msra.mxu1 %v1117_v28  ;;  %v1106_v9 = vcombine.high %v41_v4, %v49_v5  ;;  %v32_v11 = vld [vmem:[%s1639_s0 + $0x50] sm:$0xff]  ;;  %v25_v12 = vld [vmem:[%s1639_s0 + $0x18] sm:$0xff]  ;;  %v1105_v15 = vcombine.low %v41_v4, %v49_v5  ;;  %v91_v19 = vld [vmem:[%s1639_s0 + $0x228] sm:$0xff]  ;;  %v1156_v22 = vcombine.high %v90_v18, %v90_v18 }
   0xe   :  { %525 = vmatprep.subr.bf16.mxu0 %v1100_v29  ;;  %566 = vmatprep.subr.bf16.mxu1 %v1102_v30  ;;  %v33_v13 = vld [vmem:[%s1639_s0 + $0x58] sm:$0xff]  ;;  %v1088_v16 = vcombine.high %v24_v10, %v32_v11  ;;  %v1087_v20 = vcombine.low %v24_v10, %v32_v11  ;;  %v1158_v23 = vcombine.high %v91_v19, %v91_v19  ;;  %v74_v26 = vld [vmem:[%s1639_s0 + $0x1a0] sm:$0xff]  ;;  %v75_v28 = vld [vmem:[%s1639_s0 + $0x1a8] sm:$0xff] }
   0xf   :  { %v1090_v17 = vcombine.high %v25_v12, %v33_v13  ;;  %v1089_v21 = vcombine.low %v25_v12, %v33_v13  ;;  %v1155_v24 = vcombine.low %v90_v18, %v90_v18  ;;  %v1157_v25 = vcombine.low %v91_v19, %v91_v19  ;;  %v82_v27 = vld [vmem:[%s1639_s0 + $0x1e0] sm:$0xff]  ;;  %v83_v29 = vld [vmem:[%s1639_s0 + $0x1e8] sm:$0xff]  ;;  %v92_v59 = vld [vmem:[%s1639_s0 + $0x230] sm:$0xff] }
  0x10   :  { %v1140_v32 = vcombine.high %v74_v26, %v82_v27  ;;  %v1142_v33 = vcombine.high %v75_v28, %v83_v29  ;;  %v58_v34 = vld [vmem:[%s1639_s0 + $0x120] sm:$0xff]  ;;  %v1141_v39 = vcombine.low %v75_v28, %v83_v29  ;;  %v51_v45 = vld [vmem:[%s1639_s0 + $0xe8] sm:$0xff]  ;;  %v1159_v1 = vcombine.low %v92_v59, %v92_v59  ;;  %v76_v4 = vld [vmem:[%s1639_s0 + $0x1b0] sm:$0xff] }
  0x11   :  { %526 = vmatpush1.bf16.msra.mxu0 %v1099_v35  ;;  %567 = vmatpush1.bf16.msra.mxu1 %v1101_v36  ;;  %v490_v30 = vsel %vm464_vm0, %v1155_v24, 0  ;;  %v496_v31 = vsel %vm464_vm0, %v1157_v25, 0  ;;  %v66_v35 = vld [vmem:[%s1639_s0 + $0x160] sm:$0xff]  ;;  %v59_v36 = vld [vmem:[%s1639_s0 + $0x128] sm:$0xff]  ;;  %v84_v5 = vld [vmem:[%s1639_s0 + $0x1f0] sm:$0xff] }
  0x12   :  { %527 = vmatprep.subr.bf16.mxu0 %v1084_v37  ;;  %568 = vmatprep.subr.bf16.mxu1 %v1086_v38  ;;  %v67_v37 = vld [vmem:[%s1639_s0 + $0x168] sm:$0xff]  ;;  %v1139_v38 = vcombine.low %v74_v26, %v82_v27  ;;  %v1124_v40 = vcombine.high %v58_v34, %v66_v35  ;;  %v1123_v46 = vcombine.low %v58_v34, %v66_v35  ;;  %v26_v50 = vld [vmem:[%s1639_s0 + $0x20] sm:$0xff]  ;;  %v60_v12 = vld [vmem:[%s1639_s0 + $0x130] sm:$0xff] }
  0x13   :  { %v1125_v47 = vcombine.low %v59_v36, %v67_v37  ;;  %v1144_v10 = vcombine.high %v76_v4, %v84_v5  ;;  %v68_v13 = vld [vmem:[%s1639_s0 + $0x170] sm:$0xff] }
  0x14   :  { %v1128_v18 = vcombine.high %v60_v12, %v68_v13  ;;  %v1127_v24 = vcombine.low %v60_v12, %v68_v13  ;;  %v28_v28 = vld [vmem:[%s1639_s0 + $0x30] sm:$0xff] }
  0x15   :  { %528 = vmatpush1.bf16.msra.mxu0 %v1083_v41  ;;  %569 = vmatpush1.bf16.msra.mxu1 %v1085_v42  ;;  %v1126_v41 = vcombine.high %v59_v36, %v67_v37  ;;  %v42_v42 = vld [vmem:[%s1639_s0 + $0xa0] sm:$0xff]  ;;  %v36_v29 = vld [vmem:[%s1639_s0 + $0x70] sm:$0xff] }
  0x16   :  { %1167 = vmatprep.subr.msk.bf16.mxu0 %vm464_vm0, %v1152_v43  ;;  %1169 = vmatprep.subr.msk.bf16.mxu1 %vm464_vm0, %v1154_v44  ;;  %v50_v43 = vld [vmem:[%s1639_s0 + $0xe0] sm:$0xff]  ;;  %v43_v44 = vld [vmem:[%s1639_s0 + $0xa8] sm:$0xff]  ;;  %v1095_v35 = vcombine.low %v28_v28, %v36_v29 }
  0x17   :  { %v1108_v48 = vcombine.high %v42_v42, %v50_v43  ;;  %v1110_v49 = vcombine.high %v43_v44, %v51_v45  ;;  %v1109_v56 = vcombine.low %v43_v44, %v51_v45 }
  0x18   :  { %1164 = vmatmul.mubr.msk.bf16.vlgmr.msra.gmra.mxu0 %vm460_vm1, %v1330_v51  ;;  %1166 = vmatmul.mubr.msk.bf16.vlgmr.msra.gmra.mxu1 %vm460_vm1, %v1330_v51 }
  0x19   :  { %602 = vmatpush1.bf16.msra.mxu0 %v478_v52  ;;  %643 = vmatpush1.bf16.msra.mxu1 %v484_v53  ;;  %v34_v52 = vld [vmem:[%s1639_s0 + $0x60] sm:$0xff]  ;;  %v27_v53 = vld [vmem:[%s1639_s0 + $0x28] sm:$0xff] }
  0x1a   :  { %603 = vmatprep.subr.bf16.mxu0 %v1136_v54  ;;  %644 = vmatprep.subr.bf16.mxu1 %v1138_v55  ;;  %v35_v54 = vld [vmem:[%s1639_s0 + $0x68] sm:$0xff]  ;;  %v1107_v55 = vcombine.low %v42_v42, %v50_v43  ;;  %v1092_v57 = vcombine.high %v26_v50, %v34_v52 }
  0x1b   :  { %627 = vmatprep.mubr.bf16.mxu0 %v1216_v3  ;;  %668 = vmatprep.mubr.bf16.mxu1 %v1216_v3  ;;  %v1094_v58 = vcombine.high %v27_v53, %v35_v54  ;;  %v1093_v62 = vcombine.low %v27_v53, %v35_v54 }
  0x1d   :  { %604 = vmatpush1.bf16.msra.mxu0 %v1135_v60  ;;  %645 = vmatpush1.bf16.msra.mxu1 %v1137_v61  ;;  %v93_v60 = vld [vmem:[%s1639_s0 + $0x238] sm:$0xff]  ;;  %v1091_v61 = vcombine.low %v26_v50, %v34_v52 }
  0x1e   :  { %605 = vmatprep.subr.bf16.mxu0 %v1120_v63  ;;  %646 = vmatprep.subr.bf16.mxu1 %v1122_v0  ;;  %v1160_v63 = vcombine.high %v92_v59, %v92_v59  ;;  %v1162_v0 = vcombine.high %v93_v60, %v93_v60  ;;  %v1161_v2 = vcombine.low %v93_v60, %v93_v60 }
  0x21   :  { %606 = vmatpush1.bf16.msra.mxu0 %v1119_v6  ;;  %647 = vmatpush1.bf16.msra.mxu1 %v1121_v7  ;;  %v77_v6 = vld [vmem:[%s1639_s0 + $0x1b8] sm:$0xff] }
  0x22   :  { %607 = vmatprep.subr.bf16.mxu0 %v1104_v8  ;;  %648 = vmatprep.subr.bf16.mxu1 %v1106_v9  ;;  %v85_v7 = vld [vmem:[%s1639_s0 + $0x1f8] sm:$0xff]  ;;  %v502_v8 = vsel %vm464_vm0, %v1159_v1, 0  ;;  %v508_v9 = vsel %vm464_vm0, %v1161_v2, 0 }
  0x23   :  { %v1146_v11 = vcombine.high %v77_v6, %v85_v7 }
  0x25   :  { %608 = vmatpush1.bf16.msra.mxu0 %v1103_v14  ;;  %649 = vmatpush1.bf16.msra.mxu1 %v1105_v15  ;;  %v61_v14 = vld [vmem:[%s1639_s0 + $0x138] sm:$0xff] }
  0x26   :  { %609 = vmatprep.subr.bf16.mxu0 %v1088_v16  ;;  %650 = vmatprep.subr.bf16.mxu1 %v1090_v17  ;;  %v69_v15 = vld [vmem:[%s1639_s0 + $0x178] sm:$0xff]  ;;  %v1143_v16 = vcombine.low %v76_v4, %v84_v5  ;;  %v1145_v17 = vcombine.low %v77_v6, %v85_v7 }
  0x27   :  { %v1130_v19 = vcombine.high %v61_v14, %v69_v15  ;;  %v1129_v25 = vcombine.low %v61_v14, %v69_v15 }
  0x29   :  { %610 = vmatpush1.bf16.msra.mxu0 %v1087_v20  ;;  %651 = vmatpush1.bf16.msra.mxu1 %v1089_v21  ;;  %v44_v20 = vld [vmem:[%s1639_s0 + $0xb0] sm:$0xff] }
  0x2a   :  { %1171 = vmatprep.subr.msk.bf16.mxu0 %vm464_vm0, %v1156_v22  ;;  %1173 = vmatprep.subr.msk.bf16.mxu1 %vm464_vm0, %v1158_v23  ;;  %v52_v21 = vld [vmem:[%s1639_s0 + $0xf0] sm:$0xff]  ;;  %v45_v22 = vld [vmem:[%s1639_s0 + $0xb8] sm:$0xff] }
  0x2b   :  { %v53_v23 = vld [vmem:[%s1639_s0 + $0xf8] sm:$0xff]  ;;  %v1112_v26 = vcombine.high %v44_v20, %v52_v21 }
  0x2c   :  { %1168 = vmatmul.mubr.msk.bf16.vlgmr.msra.gmra.mxu0 %vm460_vm1, %v1330_v51  ;;  %1170 = vmatmul.mubr.msk.bf16.vlgmr.msra.gmra.mxu1 %vm460_vm1, %v1330_v51  ;;  %v1114_v27 = vcombine.high %v45_v22, %v53_v23 }
  0x2d   :  { %684 = vmatpush1.bf16.msra.mxu0 %v490_v30  ;;  %725 = vmatpush1.bf16.msra.mxu1 %v496_v31  ;;  %v37_v30 = vld [vmem:[%s1639_s0 + $0x78] sm:$0xff]  ;;  %v1111_v31 = vcombine.low %v44_v20, %v52_v21 }
  0x2e   :  { %685 = vmatprep.subr.bf16.mxu0 %v1140_v32  ;;  %726 = vmatprep.subr.bf16.mxu1 %v1142_v33  ;;  %v1113_v32 = vcombine.low %v45_v22, %v53_v23  ;;  %v1096_v33 = vcombine.high %v28_v28, %v36_v29 }
  0x2f   :  { %709 = vmatprep.mubr.bf16.mxu0 %v1216_v3  ;;  %750 = vmatprep.mubr.bf16.mxu1 %v1216_v3 }
  0x31   :  { %686 = vmatpush1.bf16.msra.mxu0 %v1139_v38  ;;  %727 = vmatpush1.bf16.msra.mxu1 %v1141_v39 }
  0x32   :  { %687 = vmatprep.subr.bf16.mxu0 %v1124_v40  ;;  %728 = vmatprep.subr.bf16.mxu1 %v1126_v41 }
  0x35   :  { %688 = vmatpush1.bf16.msra.mxu0 %v1123_v46  ;;  %729 = vmatpush1.bf16.msra.mxu1 %v1125_v47 }
  0x36   :  { %689 = vmatprep.subr.bf16.mxu0 %v1108_v48  ;;  %730 = vmatprep.subr.bf16.mxu1 %v1110_v49 }
  0x39   :  { %690 = vmatpush1.bf16.msra.mxu0 %v1107_v55  ;;  %731 = vmatpush1.bf16.msra.mxu1 %v1109_v56 }
  0x3a   :  { %691 = vmatprep.subr.bf16.mxu0 %v1092_v57  ;;  %732 = vmatprep.subr.bf16.mxu1 %v1094_v58 }
  0x3d   :  { %692 = vmatpush1.bf16.msra.mxu0 %v1091_v61  ;;  %733 = vmatpush1.bf16.msra.mxu1 %v1093_v62 }
  0x3e   :  { %1175 = vmatprep.subr.msk.bf16.mxu0 %vm464_vm0, %v1160_v63  ;;  %1177 = vmatprep.subr.msk.bf16.mxu1 %vm464_vm0, %v1162_v0 }
  0x40   :  { %1172 = vmatmul.mubr.msk.bf16.vlgmr.msra.gmra.mxu0 %vm460_vm1, %v1330_v51  ;;  %1174 = vmatmul.mubr.msk.bf16.vlgmr.msra.gmra.mxu1 %vm460_vm1, %v1330_v51 }
  0x41   :  { %766 = vmatpush1.bf16.msra.mxu0 %v502_v8  ;;  %807 = vmatpush1.bf16.msra.mxu1 %v508_v9 }
  0x42   :  { %767 = vmatprep.subr.bf16.mxu0 %v1144_v10  ;;  %808 = vmatprep.subr.bf16.mxu1 %v1146_v11 }
  0x43   :  { %791 = vmatprep.mubr.bf16.mxu0 %v1216_v3  ;;  %832 = vmatprep.mubr.bf16.mxu1 %v1216_v3  ;;  %v29_v3 = vld [vmem:[%s1639_s0 + $0x38] sm:$0xff] }
  0x44   :  { %v1098_v34 = vcombine.high %v29_v3, %v37_v30  ;;  %v1097_v36 = vcombine.low %v29_v3, %v37_v30 }
  0x45   :  { %768 = vmatpush1.bf16.msra.mxu0 %v1143_v16  ;;  %809 = vmatpush1.bf16.msra.mxu1 %v1145_v17 }
  0x46   :  { %769 = vmatprep.subr.bf16.mxu0 %v1128_v18  ;;  %810 = vmatprep.subr.bf16.mxu1 %v1130_v19 }
  0x49   :  { %770 = vmatpush1.bf16.msra.mxu0 %v1127_v24  ;;  %811 = vmatpush1.bf16.msra.mxu1 %v1129_v25 }
  0x4a   :  { %771 = vmatprep.subr.bf16.mxu0 %v1112_v26  ;;  %812 = vmatprep.subr.bf16.mxu1 %v1114_v27 }
  0x4d   :  { %772 = vmatpush1.bf16.msra.mxu0 %v1111_v31  ;;  %813 = vmatpush1.bf16.msra.mxu1 %v1113_v32 }
  0x4e   :  { %773 = vmatprep.subr.bf16.mxu0 %v1096_v33  ;;  %814 = vmatprep.subr.bf16.mxu1 %v1098_v34 }
  0x51   :  { %774 = vmatpush1.bf16.msra.mxu0 %v1095_v35  ;;  %815 = vmatpush1.bf16.msra.mxu1 %v1097_v36 }
  0x54   :  { %1176 = vmatmul.mubr.msk.bf16.vlgmr.msra.gmra.mxu0 %vm460_vm1, %v1330_v51  ;;  %1178 = vmatmul.mubr.msk.bf16.vlgmr.msra.gmra.mxu1 %vm460_vm1, %v1330_v51 }
  0x87   :  { %v98_v45 = vpop.permute.xlu0 %97 }
  0xd8   :  { %v547_v37 = vpop.f32.mrf.mxu0  ;;  %v588_v38 = vpop.f32.mrf.mxu1 }
  0xd9   :  { %v1513_v48 = vadd.f32 %v547_v37, %v98_v45  ;;  %v1519_v55 = vadd.f32 %v588_v38, %v98_v45 }
  0xda   :  { %v549_v39 = vpop.f32.mrf.mxu0  ;;  %v590_v40 = vpop.f32.mrf.mxu1 }
  0xdb   :  { %v1515_v49 = vadd.f32 %v549_v39, %v98_v45  ;;  %v1521_v58 = vadd.f32 %v590_v40, %v98_v45 }
  0xdc   :  { %v551_v41 = vpop.f32.mrf.mxu0  ;;  %v592_v42 = vpop.f32.mrf.mxu1 }
  0xdd   :  { %v841_v51 = vadd.f32 %v1515_v49, %v1513_v48 }
  0xde   :  { %v552_v43 = vpop.f32.mrf.mxu0  ;;  %v593_v44 = vpop.f32.mrf.mxu1 }
  0xdf   :  { %v842_v59 = vadd.f32 %v841_v51, %v1519_v55 }
  0xe1   :  { %v843_v61 = vadd.f32 %v842_v59, %v1521_v58 }
  0xec   :  { %v629_v46 = vpop.f32.mrf.mxu0  ;;  %v670_v47 = vpop.f32.mrf.mxu1 }
  0xed   :  { %v1524_v60 = vadd.f32 %v629_v46, %v98_v45  ;;  %v1530_v0 = vadd.f32 %v670_v47, %v98_v45 }
  0xee   :  { %v631_v50 = vpop.f32.mrf.mxu0  ;;  %v672_v52 = vpop.f32.mrf.mxu1 }
  0xef   :  { %v844_v62 = vadd.f32 %v843_v61, %v1524_v60  ;;  %v1528_v63 = vadd.f32 %v631_v50, %v98_v45  ;;  %v1533_v7 = vadd.f32 %v672_v52, %v98_v45 }
  0xf0   :  { %v633_v53 = vpop.f32.mrf.mxu0  ;;  %v674_v54 = vpop.f32.mrf.mxu1 }
  0xf1   :  { %v845_v1 = vadd.f32 %v844_v62, %v1528_v63 }
  0xf2   :  { %v634_v56 = vpop.f32.mrf.mxu0  ;;  %v675_v57 = vpop.f32.mrf.mxu1 }
  0xf3   :  { %v846_v8 = vadd.f32 %v845_v1, %v1530_v0 }
  0xf5   :  { %v847_v14 = vadd.f32 %v846_v8, %v1533_v7 }
 0x100   :  { %v711_v2 = vpop.f32.mrf.mxu0  ;;  %v752_v4 = vpop.f32.mrf.mxu1 }
 0x101   :  { %v1536_v11 = vadd.f32 %v711_v2, %v98_v45  ;;  %v1543_v18 = vadd.f32 %v752_v4, %v98_v45 }
 0x102   :  { %v713_v5 = vpop.f32.mrf.mxu0  ;;  %v754_v6 = vpop.f32.mrf.mxu1 }
 0x103   :  { %v848_v15 = vadd.f32 %v847_v14, %v1536_v11  ;;  %v1540_v16 = vadd.f32 %v713_v5, %v98_v45  ;;  %v1546_v20 = vadd.f32 %v754_v6, %v98_v45 }
 0x104   :  { %v715_v9 = vpop.f32.mrf.mxu0  ;;  %v756_v10 = vpop.f32.mrf.mxu1 }
 0x105   :  { %v849_v17 = vadd.f32 %v848_v15, %v1540_v16 }
 0x106   :  { %v716_v12 = vpop.f32.mrf.mxu0  ;;  %v757_v13 = vpop.f32.mrf.mxu1 }
 0x107   :  { %v850_v19 = vadd.f32 %v849_v17, %v1543_v18 }
 0x109   :  { %v851_v23 = vadd.f32 %v850_v19, %v1546_v20 }
 0x114   :  { %v793_v21 = vpop.f32.mrf.mxu0  ;;  %v834_v22 = vpop.f32.mrf.mxu1 }
 0x115   :  { %v1549_v24 = vadd.f32 %v793_v21, %v98_v45  ;;  %v1554_v30 = vadd.f32 %v834_v22, %v98_v45 }
 0x116   :  { %v795_v25 = vpop.f32.mrf.mxu0  ;;  %v836_v26 = vpop.f32.mrf.mxu1 }
 0x117   :  { %v852_v27 = vadd.f32 %v851_v23, %v1549_v24  ;;  %v1552_v28 = vadd.f32 %v795_v25, %v98_v45  ;;  %v1557_v34 = vadd.f32 %v836_v26, %v98_v45 }
 0x118   :  { %v797_v29 = vpop.f32.mrf.mxu0  ;;  %v838_v3 = vpop.f32.mrf.mxu1 }
 0x119   :  { %v853_v31 = vadd.f32 %v852_v27, %v1552_v28 }
 0x11a   :  { %v798_v32 = vpop.f32.mrf.mxu0  ;;  %v839_v33 = vpop.f32.mrf.mxu1 }
 0x11b   :  { %v854_v35 = vadd.f32 %v853_v31, %v1554_v30 }
 0x11d   :  { %v855_v36 = vadd.f32 %v854_v35, %v1557_v34 }
 0x11f   :  { %856 = vadd.xlane.f32.xlu0 %v855_v36 }
 0x1a8   :  { %v857_v37 = vpop.xlane.xlu0 %856 }
 0x1a9   :  { %v859_v38 = vmul.f32 0.00048828125, %v857_v37 }
 0x1ab   :  { %v860_v39 = vsub.f32 %v1513_v48, %v859_v38  ;;  %v861_v40 = vsub.f32 %v1515_v49, %v859_v38  ;;  %v862_v41 = vsub.f32 %v1519_v55, %v859_v38  ;;  %v863_v44 = vsub.f32 %v1521_v58, %v859_v38 }
 0x1ac   :  { %v864_v45 = vsub.f32 %v1524_v60, %v859_v38  ;;  %v865_v50 = vsub.f32 %v1528_v63, %v859_v38  ;;  %v866_v54 = vsub.f32 %v1530_v0, %v859_v38  ;;  %v867_v57 = vsub.f32 %v1533_v7, %v859_v38 }
 0x1ad   :  { %v876_v42 = vmul.f32 %v860_v39, %v860_v39  ;;  %v877_v43 = vmul.f32 %v861_v40, %v861_v40  ;;  %v878_v46 = vmul.f32 %v862_v41, %v862_v41  ;;  %v879_v52 = vmul.f32 %v863_v44, %v863_v44 }
 0x1ae   :  { %v880_v51 = vmul.f32 %v864_v45, %v864_v45  ;;  %v881_v59 = vmul.f32 %v865_v50, %v865_v50  ;;  %v868_v62 = vsub.f32 %v1536_v11, %v859_v38  ;;  %v882_v1 = vmul.f32 %v866_v54, %v866_v54  ;;  %v914_v45 = vld [vmem:[%s1643_s4] sm:$0xff] }
 0x1af   :  { %v892_v47 = vadd.f32 %v877_v43, %v876_v42  ;;  %v869_v4 = vsub.f32 %v1540_v16, %v859_v38  ;;  %v883_v5 = vmul.f32 %v867_v57, %v867_v57  ;;  %v870_v8 = vsub.f32 %v1543_v18, %v859_v38  ;;  %v910_v42 = vld [vmem:[%s1642_s3] sm:$0xff] }
 0x1b0   :  { %v884_v9 = vmul.f32 %v868_v62, %v868_v62  ;;  %v871_v12 = vsub.f32 %v1546_v20, %v859_v38  ;;  %v872_v15 = vsub.f32 %v1549_v24, %v859_v38  ;;  %v873_v21 = vsub.f32 %v1552_v28, %v859_v38 }
 0x1b1   :  { %v893_v53 = vadd.f32 %v892_v47, %v878_v46  ;;  %v885_v13 = vmul.f32 %v869_v4, %v869_v4  ;;  %v886_v17 = vmul.f32 %v870_v8, %v870_v8  ;;  %v874_v25 = vsub.f32 %v1554_v30, %v859_v38 }
 0x1b2   :  { %v887_v22 = vmul.f32 %v871_v12, %v871_v12  ;;  %v888_v26 = vmul.f32 %v872_v15, %v872_v15  ;;  %v875_v29 = vsub.f32 %v1557_v34, %v859_v38  ;;  %v889_v3 = vmul.f32 %v873_v21, %v873_v21 }
 0x1b3   :  { %v894_v56 = vadd.f32 %v893_v53, %v879_v52  ;;  %v890_v32 = vmul.f32 %v874_v25, %v874_v25 }
 0x1b4   :  { %v891_v35 = vmul.f32 %v875_v29, %v875_v29 }
 0x1b5   :  { %v895_v61 = vadd.f32 %v894_v56, %v880_v51 }
 0x1b7   :  { %v896_v2 = vadd.f32 %v895_v61, %v881_v59 }
 0x1b9   :  { %v897_v6 = vadd.f32 %v896_v2, %v882_v1 }
 0x1bb   :  { %v898_v10 = vadd.f32 %v897_v6, %v883_v5 }
 0x1bd   :  { %v899_v14 = vadd.f32 %v898_v10, %v884_v9 }
 0x1bf   :  { %v900_v19 = vadd.f32 %v899_v14, %v885_v13 }
 0x1c1   :  { %v901_v23 = vadd.f32 %v900_v19, %v886_v17 }
 0x1c3   :  { %v902_v27 = vadd.f32 %v901_v23, %v887_v22 }
 0x1c5   :  { %v903_v31 = vadd.f32 %v902_v27, %v888_v26 }
 0x1c7   :  { %v904_v33 = vadd.f32 %v903_v31, %v889_v3 }
 0x1c9   :  { %v905_v36 = vadd.f32 %v904_v33, %v890_v32 }
 0x1cb   :  { %v906_v37 = vadd.f32 %v905_v36, %v891_v35 }
 0x1cd   :  { %907 = vadd.xlane.f32.xlu1 %v906_v37 }
 0x256   :  { %v908_v39 = vpop.xlane.xlu1 %907 }
 0x257   :  { %v909_v40 = vmul.f32 0.00048828125, %v908_v39 }
 0x259   :  { %v911_v41 = vadd.f32 1e-05, %v909_v40 }
 0x25b   :  { %1214 = vrsqrt.f32 %v911_v41 }
 0x268   :  { %v1215_v43 = vpop.eup %1214 }
 0x269   :  { %v913_v44 = vmul.f32 %v1215_v43, %v910_v42 }
 0x26b   :  { %919 = vperm.xlu1 %1197, %v913_v44   ;;  %v915_v46 = vmul.f32 %v913_v44, %v859_v38 }
 0x26d   :  { %v916_v47 = vsub.f32 %v914_v45, %v915_v46 }
 0x26f   :  { %940 = vperm.xlu1 %1197, %v916_v47  }
 0x2e6   :  { %v920_v50 = vpop.permute.xlu1 %919 }
 0x2e7   :  { %v922_v52 = vmul.f32 %v920_v50, %v1513_v48  ;;  %v923_v53 = vmul.f32 %v920_v50, %v1515_v49  ;;  %v924_v54 = vmul.f32 %v920_v50, %v1519_v55  ;;  %v925_v51 = vmul.f32 %v920_v50, %v1521_v58 }
 0x2e8   :  { %v926_v56 = vmul.f32 %v920_v50, %v1524_v60  ;;  %v927_v57 = vmul.f32 %v920_v50, %v1528_v63  ;;  %v928_v59 = vmul.f32 %v920_v50, %v1530_v0  ;;  %v929_v61 = vmul.f32 %v920_v50, %v1533_v7 }
 0x2e9   :  { %v930_v38 = vmul.f32 %v920_v50, %v1536_v11  ;;  %v931_v62 = vmul.f32 %v920_v50, %v1540_v16  ;;  %v932_v48 = vmul.f32 %v920_v50, %v1543_v18  ;;  %v933_v49 = vmul.f32 %v920_v50, %v1546_v20 }
 0x2ea   :  { %v934_v55 = vmul.f32 %v920_v50, %v1549_v24  ;;  %v935_v58 = vmul.f32 %v920_v50, %v1552_v28  ;;  %v936_v60 = vmul.f32 %v920_v50, %v1554_v30  ;;  %v937_v63 = vmul.f32 %v920_v50, %v1557_v34  ;;  %v941_v1 = vpop.permute.xlu1 %940 }
 0x2eb   :  { %v943_v0 = vadd.f32 %v941_v1, %v922_v52  ;;  %v944_v2 = vadd.f32 %v941_v1, %v923_v53  ;;  %v945_v7 = vadd.f32 %v941_v1, %v924_v54  ;;  %v946_v4 = vadd.f32 %v941_v1, %v925_v51 }
 0x2ec   :  { %v947_v11 = vadd.f32 %v941_v1, %v926_v56  ;;  %v948_v5 = vadd.f32 %v941_v1, %v927_v57  ;;  %v949_v16 = vadd.f32 %v941_v1, %v928_v59  ;;  %v950_v6 = vadd.f32 %v941_v1, %v929_v61 }
 0x2ed   :  { %v951_v18 = vadd.f32 %v941_v1, %v930_v38  ;;  %v952_v8 = vadd.f32 %v941_v1, %v931_v62  ;;  %v953_v20 = vadd.f32 %v941_v1, %v932_v48  ;;  %v954_v9 = vadd.f32 %v941_v1, %v933_v49 }
 0x2ee   :  { %v955_v24 = vadd.f32 %v941_v1, %v934_v55  ;;  %v956_v10 = vadd.f32 %v941_v1, %v935_v58  ;;  %v957_v28 = vadd.f32 %v941_v1, %v936_v60  ;;  %v958_v12 = vadd.f32 %v941_v1, %v937_v63 }
 0x2ef   :  { %vm959_vm2 = vcmp.ge.f32.partialorder %v943_v0, 0.0  ;;  %vm960_vm3 = vcmp.ge.f32.partialorder %v944_v2, 0.0  ;;  %vm961_vm4 = vcmp.ge.f32.partialorder %v945_v7, 0.0  ;;  %vm962_vm5 = vcmp.ge.f32.partialorder %v946_v4, 0.0 }
 0x2f0   :  { %vm963_vm6 = vcmp.ge.f32.partialorder %v947_v11, 0.0  ;;  %vm964_vm7 = vcmp.ge.f32.partialorder %v948_v5, 0.0  ;;  %vm965_vm8 = vcmp.ge.f32.partialorder %v949_v16, 0.0  ;;  %vm966_vm9 = vcmp.ge.f32.partialorder %v950_v6, 0.0 }
 0x2f1   :  { %vm967_vm10 = vcmp.ge.f32.partialorder %v951_v18, 0.0  ;;  %vm968_vm11 = vcmp.ge.f32.partialorder %v952_v8, 0.0  ;;  %vm969_vm12 = vcmp.ge.f32.partialorder %v953_v20, 0.0  ;;  %vm970_vm13 = vcmp.ge.f32.partialorder %v954_v9, 0.0 }
 0x2f2   :  { %vm971_vm14 = vcmp.ge.f32.partialorder %v955_v24, 0.0  ;;  %vm972_vm15 = vcmp.ge.f32.partialorder %v956_v10, 0.0  ;;  %vm973_vm0 = vcmp.ge.f32.partialorder %v957_v28, 0.0  ;;  %vm974_vm1 = vcmp.ge.f32.partialorder %v958_v12, 0.0 }
 0x2f3   :  { %v975_v30 = vmul.f32 0.01, %v943_v0  ;;  %v976_v34 = vmul.f32 0.01, %v944_v2  ;;  %v977_v13 = vmul.f32 0.01, %v945_v7 }
 0x2f4   :  { %v978_v14 = vmul.f32 0.01, %v946_v4  ;;  %v979_v15 = vmul.f32 0.01, %v947_v11  ;;  %v980_v17 = vmul.f32 0.01, %v948_v5 }
 0x2f5   :  { %v981_v19 = vmul.f32 0.01, %v949_v16  ;;  %v982_v21 = vmul.f32 0.01, %v950_v6  ;;  %v983_v22 = vmul.f32 0.01, %v951_v18  ;;  %v991_v23 = vsel %vm959_vm2, %v943_v0, %v975_v30 }
 0x2f6   :  { %v984_v25 = vmul.f32 0.01, %v952_v8  ;;  %v985_v26 = vmul.f32 0.01, %v953_v20  ;;  %v986_v27 = vmul.f32 0.01, %v954_v9  ;;  %v992_v29 = vsel %vm960_vm3, %v944_v2, %v976_v34 }
 0x2f7   :  { %v987_v3 = vmul.f32 0.01, %v955_v24  ;;  %v988_v31 = vmul.f32 0.01, %v956_v10  ;;  %v989_v32 = vmul.f32 0.01, %v957_v28  ;;  %v993_v33 = vsel %vm961_vm4, %v945_v7, %v977_v13 }
 0x2f8   :  { %v990_v35 = vmul.f32 0.01, %v958_v12  ;;  %v994_v36 = vsel %vm962_vm5, %v946_v4, %v978_v14  ;;  %v995_v37 = vsel %vm963_vm6, %v947_v11, %v979_v15  ;;  %v996_v39 = vsel %vm964_vm7, %v948_v5, %v980_v17 }
 0x2f9   :  { %v997_v40 = vsel %vm965_vm8, %v949_v16, %v981_v19  ;;  %v998_v41 = vsel %vm966_vm9, %v950_v6, %v982_v21  ;;  %v999_v42 = vsel %vm967_vm10, %v951_v18, %v983_v22  ;;  %v1000_v43 = vsel %vm968_vm11, %v952_v8, %v984_v25 }
 0x2fa   :  { %v1001_v44 = vsel %vm969_vm12, %v953_v20, %v985_v26  ;;  %v1002_v45 = vsel %vm970_vm13, %v954_v9, %v986_v27  ;;  %v1003_v46 = vsel %vm971_vm14, %v955_v24, %v987_v3  ;;  %v1004_v47 = vsel %vm972_vm15, %v956_v10, %v988_v31 }
 0x2fb   :  { %v1005_v50 = vsel %vm973_vm0, %v957_v28, %v989_v32  ;;  %v1006_v52 = vsel %vm974_vm1, %v958_v12, %v990_v35  ;;  %v1187_v53 = vpack.c.bf16 %v992_v29, %v991_v23  ;;  %v1188_v54 = vpack.c.bf16 %v994_v36, %v993_v33 }
 0x2fc   :  { %v1189_v51 = vpack.c.bf16 %v996_v39, %v995_v37  ;;  %v1190_v56 = vpack.c.bf16 %v998_v41, %v997_v40  ;;  %v1191_v57 = vpack.c.bf16 %v1000_v43, %v999_v42  ;;  %v1192_v59 = vpack.c.bf16 %v1002_v45, %v1001_v44 }
 0x2fd   :  { %v1193_v61 = vpack.c.bf16 %v1004_v47, %v1003_v46  ;;  %v1194_v38 = vpack.c.bf16 %v1006_v52, %v1005_v50  ;;  %1071 = vst [vmem:[%s1644_s5] sm:$0xff] %v1187_v53  ;;  %1072 = vst [vmem:[%s1644_s5 + $0x8] sm:$0xff] %v1188_v54 }
 0x2fe   :  { %1073 = vst [vmem:[%s1644_s5 + $0x10] sm:$0xff] %v1189_v51  ;;  %1074 = vst [vmem:[%s1644_s5 + $0x18] sm:$0xff] %v1190_v56 }
 0x2ff   :  { %1075 = vst [vmem:[%s1644_s5 + $0x20] sm:$0xff] %v1191_v57  ;;  %1076 = vst [vmem:[%s1644_s5 + $0x28] sm:$0xff] %v1192_v59 }
 0x300   :  { %1077 = vst [vmem:[%s1644_s5 + $0x30] sm:$0xff] %v1193_v61  ;;  %1078 = vst [vmem:[%s1644_s5 + $0x38] sm:$0xff] %v1194_v38 }

// kernel: _lambda_.9
= control target key start
LH: loop header
LB: loop body
LE: loop exit
PB: predicated region body
PF: predicated region fallthrough
CT: control target
= control target key end

     0   :  { %vm464_vm0 = vcmask 1043456   ;;  %v1078_v3 = vmov 0   ;;  %vm460_vm1 = vcmask 588800   ;;  %s1385_s0 = inlined_call_operand.vmem [shape: bf16[72,2048], index: 0, kind: input, shape index: {}]   ;;  %s1386_s2 = inlined_call_operand.<no memory space> [shape: f32[1,1], index: 2, kind: input, shape index: {}]   ;;  %s1387_s1 = inlined_call_operand.vmem [shape: bf16[1,72], index: 1, kind: input, shape index: {}]   ;;  %s1388_s3 = inlined_call_operand.vmem [shape: f32[1,2048], index: 3, kind: output, shape index: {}]  }
   0x1   :  { %v82_v0 = vld [vmem:[%s1385_s0 + $0x200] sm:$0xff]  ;;  %v83_v1 = vld [vmem:[%s1385_s0 + $0x208] sm:$0xff]  ;;  %545 = vmatprep.mubr.bf16.mxu0 %v1078_v3  ;;  %586 = vmatprep.mubr.bf16.mxu1 %v1078_v3  ;;  %v8_v4 = vstv %s1386_s2  ;;  %v84_v40 = vld [vmem:[%s1385_s0 + $0x210] sm:$0xff] }
   0x2   :  { %v66_v2 = vld [vmem:[%s1385_s0 + $0x180] sm:$0xff]  ;;  %v1028_v5 = vcombine.high %v82_v0, %v82_v0  ;;  %v1030_v6 = vcombine.high %v83_v1, %v83_v1  ;;  %v1027_v7 = vcombine.low %v82_v0, %v82_v0  ;;  %v1029_v8 = vcombine.low %v83_v1, %v83_v1  ;;  %v67_v10 = vld [vmem:[%s1385_s0 + $0x188] sm:$0xff]  ;;  %1061 = vset.pattern.permute.xlu0 %v1078_v3  ;;  %v85_v41 = vld [vmem:[%s1385_s0 + $0x218] sm:$0xff] }
   0x3   :  { %v74_v9 = vld [vmem:[%s1385_s0 + $0x1c0] sm:$0xff]  ;;  %v75_v11 = vld [vmem:[%s1385_s0 + $0x1c8] sm:$0xff]  ;;  %9 = vst [vmem:[#allocation2] sm:$0x1] %v8_v4  ;;  %v1032_v44 = vcombine.high %v84_v40, %v84_v40  ;;  %v1034_v45 = vcombine.high %v85_v41, %v85_v41  ;;  %v1031_v46 = vcombine.low %v84_v40, %v84_v40  ;;  %v1033_v47 = vcombine.low %v85_v41, %v85_v41  ;;  %v68_v48 = vld [vmem:[%s1385_s0 + $0x190] sm:$0xff] }
   0x4   :  { %v1012_v12 = vcombine.high %v66_v2, %v74_v9  ;;  %v1014_v13 = vcombine.high %v67_v10, %v75_v11  ;;  %v50_v14 = vld [vmem:[%s1385_s0 + $0x100] sm:$0xff]  ;;  %v51_v16 = vld [vmem:[%s1385_s0 + $0x108] sm:$0xff]  ;;  %1043 = vmatprep.subr.msk.bf16.mxu0 %vm464_vm0, %v1028_v5  ;;  %1045 = vmatprep.subr.msk.bf16.mxu1 %vm464_vm0, %v1030_v6  ;;  %v466_v17 = vsel %vm464_vm0, %v1027_v7, 0  ;;  %v472_v18 = vsel %vm464_vm0, %v1029_v8, 0  ;;  %v76_v49 = vld [vmem:[%s1385_s0 + $0x1d0] sm:$0xff] }
   0x5   :  { %v58_v15 = vld [vmem:[%s1385_s0 + $0x140] sm:$0xff]  ;;  %v59_v19 = vld [vmem:[%s1385_s0 + $0x148] sm:$0xff]  ;;  %520 = vmatpush1.bf16.msra.mxu0 %v466_v17  ;;  %561 = vmatpush1.bf16.msra.mxu1 %v472_v18  ;;  %v1011_v20 = vcombine.low %v66_v2, %v74_v9  ;;  %v1013_v21 = vcombine.low %v67_v10, %v75_v11  ;;  %v69_v50 = vld [vmem:[%s1385_s0 + $0x198] sm:$0xff]  ;;  %v478_v53 = vsel %vm464_vm0, %v1031_v46, 0  ;;  %v484_v54 = vsel %vm464_vm0, %v1033_v47, 0 }
   0x6   :  { %521 = vmatprep.subr.bf16.mxu0 %v1012_v12  ;;  %562 = vmatprep.subr.bf16.mxu1 %v1014_v13  ;;  %v996_v22 = vcombine.high %v50_v14, %v58_v15  ;;  %v998_v23 = vcombine.high %v51_v16, %v59_v19  ;;  %v34_v24 = vld [vmem:[%s1385_s0 + $0x80] sm:$0xff]  ;;  %v35_v26 = vld [vmem:[%s1385_s0 + $0x88] sm:$0xff]  ;;  %v995_v28 = vcombine.low %v50_v14, %v58_v15  ;;  %v77_v51 = vld [vmem:[%s1385_s0 + $0x1d8] sm:$0xff] }
   0x7   :  { %v42_v25 = vld [vmem:[%s1385_s0 + $0xc0] sm:$0xff]  ;;  %v43_v27 = vld [vmem:[%s1385_s0 + $0xc8] sm:$0xff]  ;;  %v997_v29 = vcombine.low %v51_v16, %v59_v19  ;;  %v1016_v55 = vcombine.high %v68_v48, %v76_v49  ;;  %v1018_v56 = vcombine.high %v69_v50, %v77_v51  ;;  %v52_v57 = vld [vmem:[%s1385_s0 + $0x110] sm:$0xff]  ;;  %v1015_v61 = vcombine.low %v68_v48, %v76_v49 }
   0x8   :  { %v980_v30 = vcombine.high %v34_v24, %v42_v25  ;;  %v982_v31 = vcombine.high %v35_v26, %v43_v27  ;;  %v18_v32 = vld [vmem:[%s1385_s0] sm:$0xff]  ;;  %v19_v34 = vld [vmem:[%s1385_s0 + $0x8] sm:$0xff]  ;;  %v979_v36 = vcombine.low %v34_v24, %v42_v25  ;;  %v981_v37 = vcombine.low %v35_v26, %v43_v27  ;;  %v60_v58 = vld [vmem:[%s1385_s0 + $0x150] sm:$0xff] }
   0x9   :  { %522 = vmatpush1.bf16.msra.mxu0 %v1011_v20  ;;  %563 = vmatpush1.bf16.msra.mxu1 %v1013_v21  ;;  %v26_v33 = vld [vmem:[%s1385_s0 + $0x40] sm:$0xff]  ;;  %v27_v35 = vld [vmem:[%s1385_s0 + $0x48] sm:$0xff]  ;;  %v53_v59 = vld [vmem:[%s1385_s0 + $0x118] sm:$0xff]  ;;  %v1017_v62 = vcombine.low %v69_v50, %v77_v51  ;;  %v1000_v0 = vcombine.high %v52_v57, %v60_v58  ;;  %v999_v7 = vcombine.low %v52_v57, %v60_v58 }
   0xa   :  { %523 = vmatprep.subr.bf16.mxu0 %v996_v22  ;;  %564 = vmatprep.subr.bf16.mxu1 %v998_v23  ;;  %v964_v38 = vcombine.high %v18_v32, %v26_v33  ;;  %v966_v39 = vcombine.high %v19_v34, %v27_v35  ;;  %v963_v42 = vcombine.low %v18_v32, %v26_v33  ;;  %v1185_v52 = vld [vmem:[%s1387_s1] sm:$0x1]  ;;  %v61_v60 = vld [vmem:[%s1385_s0 + $0x158] sm:$0xff]  ;;  %v36_v2 = vld [vmem:[%s1385_s0 + $0x90] sm:$0xff] }
   0xb   :  { %v965_v43 = vcombine.low %v19_v34, %v27_v35  ;;  %v90_v63 = vld [vmem:[#allocation2] sm:$0x1]  ;;  %v1002_v1 = vcombine.high %v53_v59, %v61_v60  ;;  %v44_v4 = vld [vmem:[%s1385_s0 + $0xd0] sm:$0xff]  ;;  %v37_v5 = vld [vmem:[%s1385_s0 + $0x98] sm:$0xff]  ;;  %v1001_v8 = vcombine.low %v53_v59, %v61_v60 }
   0xc   :  { %v45_v6 = vld [vmem:[%s1385_s0 + $0xd8] sm:$0xff]  ;;  %93 = vperm.xlu0 %1061, %v90_v63   ;;  %v984_v9 = vcombine.high %v36_v2, %v44_v4  ;;  %v20_v11 = vld [vmem:[%s1385_s0 + $0x10] sm:$0xff]  ;;  %v983_v15 = vcombine.low %v36_v2, %v44_v4  ;;  %v86_v19 = vld [vmem:[%s1385_s0 + $0x220] sm:$0xff] }
   0xd   :  { %524 = vmatpush1.bf16.msra.mxu0 %v995_v28  ;;  %565 = vmatpush1.bf16.msra.mxu1 %v997_v29  ;;  %v986_v10 = vcombine.high %v37_v5, %v45_v6  ;;  %v28_v12 = vld [vmem:[%s1385_s0 + $0x50] sm:$0xff]  ;;  %v21_v13 = vld [vmem:[%s1385_s0 + $0x18] sm:$0xff]  ;;  %v985_v16 = vcombine.low %v37_v5, %v45_v6  ;;  %v87_v20 = vld [vmem:[%s1385_s0 + $0x228] sm:$0xff]  ;;  %v1036_v23 = vcombine.high %v86_v19, %v86_v19 }
   0xe   :  { %525 = vmatprep.subr.bf16.mxu0 %v980_v30  ;;  %566 = vmatprep.subr.bf16.mxu1 %v982_v31  ;;  %v29_v14 = vld [vmem:[%s1385_s0 + $0x58] sm:$0xff]  ;;  %v968_v17 = vcombine.high %v20_v11, %v28_v12  ;;  %v967_v21 = vcombine.low %v20_v11, %v28_v12  ;;  %v1038_v24 = vcombine.high %v87_v20, %v87_v20  ;;  %v70_v27 = vld [vmem:[%s1385_s0 + $0x1a0] sm:$0xff]  ;;  %v71_v29 = vld [vmem:[%s1385_s0 + $0x1a8] sm:$0xff] }
   0xf   :  { %v970_v18 = vcombine.high %v21_v13, %v29_v14  ;;  %v969_v22 = vcombine.low %v21_v13, %v29_v14  ;;  %v1035_v25 = vcombine.low %v86_v19, %v86_v19  ;;  %v1037_v26 = vcombine.low %v87_v20, %v87_v20  ;;  %v78_v28 = vld [vmem:[%s1385_s0 + $0x1e0] sm:$0xff]  ;;  %v79_v30 = vld [vmem:[%s1385_s0 + $0x1e8] sm:$0xff]  ;;  %v88_v60 = vld [vmem:[%s1385_s0 + $0x230] sm:$0xff] }
  0x10   :  { %v1020_v33 = vcombine.high %v70_v27, %v78_v28  ;;  %v1022_v34 = vcombine.high %v71_v29, %v79_v30  ;;  %v54_v35 = vld [vmem:[%s1385_s0 + $0x120] sm:$0xff]  ;;  %v1021_v40 = vcombine.low %v71_v29, %v79_v30  ;;  %v47_v46 = vld [vmem:[%s1385_s0 + $0xe8] sm:$0xff]  ;;  %v1039_v2 = vcombine.low %v88_v60, %v88_v60  ;;  %v72_v5 = vld [vmem:[%s1385_s0 + $0x1b0] sm:$0xff] }
  0x11   :  { %526 = vmatpush1.bf16.msra.mxu0 %v979_v36  ;;  %567 = vmatpush1.bf16.msra.mxu1 %v981_v37  ;;  %v490_v31 = vsel %vm464_vm0, %v1035_v25, 0  ;;  %v496_v32 = vsel %vm464_vm0, %v1037_v26, 0  ;;  %v62_v36 = vld [vmem:[%s1385_s0 + $0x160] sm:$0xff]  ;;  %v55_v37 = vld [vmem:[%s1385_s0 + $0x128] sm:$0xff]  ;;  %v80_v6 = vld [vmem:[%s1385_s0 + $0x1f0] sm:$0xff] }
  0x12   :  { %527 = vmatprep.subr.bf16.mxu0 %v964_v38  ;;  %568 = vmatprep.subr.bf16.mxu1 %v966_v39  ;;  %v63_v38 = vld [vmem:[%s1385_s0 + $0x168] sm:$0xff]  ;;  %v1019_v39 = vcombine.low %v70_v27, %v78_v28  ;;  %v1004_v41 = vcombine.high %v54_v35, %v62_v36  ;;  %v1003_v47 = vcombine.low %v54_v35, %v62_v36  ;;  %v22_v51 = vld [vmem:[%s1385_s0 + $0x20] sm:$0xff]  ;;  %v56_v13 = vld [vmem:[%s1385_s0 + $0x130] sm:$0xff] }
  0x13   :  { %v1005_v48 = vcombine.low %v55_v37, %v63_v38  ;;  %v1024_v11 = vcombine.high %v72_v5, %v80_v6  ;;  %v64_v14 = vld [vmem:[%s1385_s0 + $0x170] sm:$0xff] }
  0x14   :  { %v1008_v19 = vcombine.high %v56_v13, %v64_v14  ;;  %v1007_v25 = vcombine.low %v56_v13, %v64_v14  ;;  %v24_v29 = vld [vmem:[%s1385_s0 + $0x30] sm:$0xff] }
  0x15   :  { %528 = vmatpush1.bf16.msra.mxu0 %v963_v42  ;;  %569 = vmatpush1.bf16.msra.mxu1 %v965_v43  ;;  %v1006_v42 = vcombine.high %v55_v37, %v63_v38  ;;  %v38_v43 = vld [vmem:[%s1385_s0 + $0xa0] sm:$0xff]  ;;  %v32_v30 = vld [vmem:[%s1385_s0 + $0x70] sm:$0xff]  ;;  %v96_v38 = vlaneseq }
  0x16   :  { %1047 = vmatprep.subr.msk.bf16.mxu0 %vm464_vm0, %v1032_v44  ;;  %1049 = vmatprep.subr.msk.bf16.mxu1 %vm464_vm0, %v1034_v45  ;;  %v46_v44 = vld [vmem:[%s1385_s0 + $0xe0] sm:$0xff]  ;;  %v39_v45 = vld [vmem:[%s1385_s0 + $0xa8] sm:$0xff]  ;;  %v975_v36 = vcombine.low %v24_v29, %v32_v30 }
  0x17   :  { %v988_v49 = vcombine.high %v38_v43, %v46_v44  ;;  %v990_v50 = vcombine.high %v39_v45, %v47_v46  ;;  %v989_v57 = vcombine.low %v39_v45, %v47_v46 }
  0x18   :  { %1044 = vmatmul.mubr.msk.bf16.vlgmr.msra.gmra.mxu0 %vm460_vm1, %v1185_v52  ;;  %1046 = vmatmul.mubr.msk.bf16.vlgmr.msra.gmra.mxu1 %vm460_vm1, %v1185_v52 }
  0x19   :  { %602 = vmatpush1.bf16.msra.mxu0 %v478_v53  ;;  %643 = vmatpush1.bf16.msra.mxu1 %v484_v54  ;;  %v30_v53 = vld [vmem:[%s1385_s0 + $0x60] sm:$0xff]  ;;  %v23_v54 = vld [vmem:[%s1385_s0 + $0x28] sm:$0xff] }
  0x1a   :  { %603 = vmatprep.subr.bf16.mxu0 %v1016_v55  ;;  %644 = vmatprep.subr.bf16.mxu1 %v1018_v56  ;;  %v31_v55 = vld [vmem:[%s1385_s0 + $0x68] sm:$0xff]  ;;  %v987_v56 = vcombine.low %v38_v43, %v46_v44  ;;  %v972_v58 = vcombine.high %v22_v51, %v30_v53  ;;  %v97_v43 = vshrl.u32 %v96_v38, 7 }
  0x1b   :  { %627 = vmatprep.mubr.bf16.mxu0 %v1078_v3  ;;  %668 = vmatprep.mubr.bf16.mxu1 %v1078_v3  ;;  %v974_v59 = vcombine.high %v23_v54, %v31_v55  ;;  %v973_v63 = vcombine.low %v23_v54, %v31_v55 }
  0x1d   :  { %604 = vmatpush1.bf16.msra.mxu0 %v1015_v61  ;;  %645 = vmatpush1.bf16.msra.mxu1 %v1017_v62  ;;  %v89_v61 = vld [vmem:[%s1385_s0 + $0x238] sm:$0xff]  ;;  %v971_v62 = vcombine.low %v22_v51, %v30_v53 }
  0x1e   :  { %605 = vmatprep.subr.bf16.mxu0 %v1000_v0  ;;  %646 = vmatprep.subr.bf16.mxu1 %v1002_v1  ;;  %v1040_v0 = vcombine.high %v88_v60, %v88_v60  ;;  %v1042_v1 = vcombine.high %v89_v61, %v89_v61  ;;  %v1041_v4 = vcombine.low %v89_v61, %v89_v61 }
  0x21   :  { %606 = vmatpush1.bf16.msra.mxu0 %v999_v7  ;;  %647 = vmatpush1.bf16.msra.mxu1 %v1001_v8  ;;  %v73_v7 = vld [vmem:[%s1385_s0 + $0x1b8] sm:$0xff] }
  0x22   :  { %607 = vmatprep.subr.bf16.mxu0 %v984_v9  ;;  %648 = vmatprep.subr.bf16.mxu1 %v986_v10  ;;  %v81_v8 = vld [vmem:[%s1385_s0 + $0x1f8] sm:$0xff]  ;;  %v502_v9 = vsel %vm464_vm0, %v1039_v2, 0  ;;  %v508_v10 = vsel %vm464_vm0, %v1041_v4, 0 }
  0x23   :  { %v1026_v12 = vcombine.high %v73_v7, %v81_v8 }
  0x25   :  { %608 = vmatpush1.bf16.msra.mxu0 %v983_v15  ;;  %649 = vmatpush1.bf16.msra.mxu1 %v985_v16  ;;  %v57_v15 = vld [vmem:[%s1385_s0 + $0x138] sm:$0xff] }
  0x26   :  { %609 = vmatprep.subr.bf16.mxu0 %v968_v17  ;;  %650 = vmatprep.subr.bf16.mxu1 %v970_v18  ;;  %v65_v16 = vld [vmem:[%s1385_s0 + $0x178] sm:$0xff]  ;;  %v1023_v17 = vcombine.low %v72_v5, %v80_v6  ;;  %v1025_v18 = vcombine.low %v73_v7, %v81_v8 }
  0x27   :  { %v1010_v20 = vcombine.high %v57_v15, %v65_v16  ;;  %v1009_v26 = vcombine.low %v57_v15, %v65_v16 }
  0x29   :  { %610 = vmatpush1.bf16.msra.mxu0 %v967_v21  ;;  %651 = vmatpush1.bf16.msra.mxu1 %v969_v22  ;;  %v40_v21 = vld [vmem:[%s1385_s0 + $0xb0] sm:$0xff] }
  0x2a   :  { %1051 = vmatprep.subr.msk.bf16.mxu0 %vm464_vm0, %v1036_v23  ;;  %1053 = vmatprep.subr.msk.bf16.mxu1 %vm464_vm0, %v1038_v24  ;;  %v48_v22 = vld [vmem:[%s1385_s0 + $0xf0] sm:$0xff]  ;;  %v41_v23 = vld [vmem:[%s1385_s0 + $0xb8] sm:$0xff] }
  0x2b   :  { %v49_v24 = vld [vmem:[%s1385_s0 + $0xf8] sm:$0xff]  ;;  %v992_v27 = vcombine.high %v40_v21, %v48_v22 }
  0x2c   :  { %1048 = vmatmul.mubr.msk.bf16.vlgmr.msra.gmra.mxu0 %vm460_vm1, %v1185_v52  ;;  %1050 = vmatmul.mubr.msk.bf16.vlgmr.msra.gmra.mxu1 %vm460_vm1, %v1185_v52  ;;  %v994_v28 = vcombine.high %v41_v23, %v49_v24 }
  0x2d   :  { %684 = vmatpush1.bf16.msra.mxu0 %v490_v31  ;;  %725 = vmatpush1.bf16.msra.mxu1 %v496_v32  ;;  %v33_v31 = vld [vmem:[%s1385_s0 + $0x78] sm:$0xff]  ;;  %v991_v32 = vcombine.low %v40_v21, %v48_v22 }
  0x2e   :  { %685 = vmatprep.subr.bf16.mxu0 %v1020_v33  ;;  %726 = vmatprep.subr.bf16.mxu1 %v1022_v34  ;;  %v993_v33 = vcombine.low %v41_v23, %v49_v24  ;;  %v976_v34 = vcombine.high %v24_v29, %v32_v30 }
  0x2f   :  { %709 = vmatprep.mubr.bf16.mxu0 %v1078_v3  ;;  %750 = vmatprep.mubr.bf16.mxu1 %v1078_v3 }
  0x31   :  { %686 = vmatpush1.bf16.msra.mxu0 %v1019_v39  ;;  %727 = vmatpush1.bf16.msra.mxu1 %v1021_v40 }
  0x32   :  { %687 = vmatprep.subr.bf16.mxu0 %v1004_v41  ;;  %728 = vmatprep.subr.bf16.mxu1 %v1006_v42 }
  0x35   :  { %688 = vmatpush1.bf16.msra.mxu0 %v1003_v47  ;;  %729 = vmatpush1.bf16.msra.mxu1 %v1005_v48  ;;  %v98_v48 = vsub.s32 0, %v97_v43 }
  0x36   :  { %689 = vmatprep.subr.bf16.mxu0 %v988_v49  ;;  %730 = vmatprep.subr.bf16.mxu1 %v990_v50  ;;  %v1079_v50 = vmov 1966171168  }
  0x37   :  { %v862_v51 = vunpack.c.l.s4 %v1079_v50 }
  0x39   :  { %690 = vmatpush1.bf16.msra.mxu0 %v987_v56  ;;  %731 = vmatpush1.bf16.msra.mxu1 %v989_v57  ;;  %v863_v54 = vunpack.c.0.s8 %v862_v51 }
  0x3a   :  { %691 = vmatprep.subr.bf16.mxu0 %v972_v58  ;;  %732 = vmatprep.subr.bf16.mxu1 %v974_v59 }
  0x3b   :  { %v1365_v58 = vsub.s32 %v863_v54, %v97_v43 }
  0x3d   :  { %692 = vmatpush1.bf16.msra.mxu0 %v971_v62  ;;  %733 = vmatpush1.bf16.msra.mxu1 %v973_v63 }
  0x3e   :  { %1055 = vmatprep.subr.msk.bf16.mxu0 %vm464_vm0, %v1040_v0  ;;  %1057 = vmatprep.subr.msk.bf16.mxu1 %vm464_vm0, %v1042_v1 }
  0x40   :  { %1052 = vmatmul.mubr.msk.bf16.vlgmr.msra.gmra.mxu0 %vm460_vm1, %v1185_v52  ;;  %1054 = vmatmul.mubr.msk.bf16.vlgmr.msra.gmra.mxu1 %vm460_vm1, %v1185_v52 }
  0x41   :  { %766 = vmatpush1.bf16.msra.mxu0 %v502_v9  ;;  %807 = vmatpush1.bf16.msra.mxu1 %v508_v10 }
  0x42   :  { %767 = vmatprep.subr.bf16.mxu0 %v1024_v11  ;;  %808 = vmatprep.subr.bf16.mxu1 %v1026_v12 }
  0x43   :  { %791 = vmatprep.mubr.bf16.mxu0 %v1078_v3  ;;  %832 = vmatprep.mubr.bf16.mxu1 %v1078_v3  ;;  %v25_v3 = vld [vmem:[%s1385_s0 + $0x38] sm:$0xff] }
  0x44   :  { %v978_v35 = vcombine.high %v25_v3, %v33_v31  ;;  %v977_v37 = vcombine.low %v25_v3, %v33_v31 }
  0x45   :  { %768 = vmatpush1.bf16.msra.mxu0 %v1023_v17  ;;  %809 = vmatpush1.bf16.msra.mxu1 %v1025_v18 }
  0x46   :  { %769 = vmatprep.subr.bf16.mxu0 %v1008_v19  ;;  %810 = vmatprep.subr.bf16.mxu1 %v1010_v20 }
  0x49   :  { %770 = vmatpush1.bf16.msra.mxu0 %v1007_v25  ;;  %811 = vmatpush1.bf16.msra.mxu1 %v1009_v26 }
  0x4a   :  { %771 = vmatprep.subr.bf16.mxu0 %v992_v27  ;;  %812 = vmatprep.subr.bf16.mxu1 %v994_v28 }
  0x4d   :  { %772 = vmatpush1.bf16.msra.mxu0 %v991_v32  ;;  %813 = vmatpush1.bf16.msra.mxu1 %v993_v33 }
  0x4e   :  { %773 = vmatprep.subr.bf16.mxu0 %v976_v34  ;;  %814 = vmatprep.subr.bf16.mxu1 %v978_v35 }
  0x51   :  { %774 = vmatpush1.bf16.msra.mxu0 %v975_v36  ;;  %815 = vmatpush1.bf16.msra.mxu1 %v977_v37 }
  0x54   :  { %1056 = vmatmul.mubr.msk.bf16.vlgmr.msra.gmra.mxu0 %vm460_vm1, %v1185_v52  ;;  %1058 = vmatmul.mubr.msk.bf16.vlgmr.msra.gmra.mxu1 %vm460_vm1, %v1185_v52 }
  0x87   :  { %v94_v49 = vpop.permute.xlu0 %93 }
  0x88   :  { %v99_v53 = vrot.slane %v94_v49, %v98_v48 }
  0xd8   :  { %v547_v39 = vpop.f32.mrf.mxu0  ;;  %v588_v40 = vpop.f32.mrf.mxu1 }
  0xd9   :  { %v548_v55 = vadd.f32 %v547_v39, %v99_v53  ;;  %v589_v56 = vadd.f32 %v588_v40, %v99_v53 }
  0xda   :  { %v549_v41 = vpop.f32.mrf.mxu0  ;;  %v590_v42 = vpop.f32.mrf.mxu1 }
  0xdb   :  { %v550_v57 = vadd.f32 %v549_v41, %v99_v53  ;;  %v591_v52 = vadd.f32 %v590_v42, %v99_v53 }
  0xdc   :  { %v551_v44 = vpop.f32.mrf.mxu0  ;;  %v592_v45 = vpop.f32.mrf.mxu1 }
  0xdd   :  { %v857_v59 = vcombine.low %v548_v55, %v550_v57  ;;  %v858_v60 = vcombine.low %v589_v56, %v591_v52 }
  0xde   :  { %v552_v46 = vpop.f32.mrf.mxu0  ;;  %v593_v47 = vpop.f32.mrf.mxu1 }
  0xdf   :  { %v867_v4 = vrot.slane %v857_v59, %v1365_v58  ;;  %v874_v5 = vrot.slane %v858_v60, %v1365_v58 }
  0xe1   :  { %v889_v14 = vcombine.low %v867_v4, %v874_v5 }
  0xe3   :  { %v897_v18 = vrot.slane %v889_v14, %v1365_v58 }
  0xec   :  { %v629_v61 = vpop.f32.mrf.mxu0  ;;  %v670_v62 = vpop.f32.mrf.mxu1 }
  0xed   :  { %v630_v63 = vadd.f32 %v629_v61, %v99_v53  ;;  %v671_v0 = vadd.f32 %v670_v62, %v99_v53 }
  0xee   :  { %v631_v1 = vpop.f32.mrf.mxu0  ;;  %v672_v2 = vpop.f32.mrf.mxu1 }
  0xef   :  { %v632_v6 = vadd.f32 %v631_v1, %v99_v53  ;;  %v673_v7 = vadd.f32 %v672_v2, %v99_v53 }
  0xf0   :  { %v633_v8 = vpop.f32.mrf.mxu0  ;;  %v674_v9 = vpop.f32.mrf.mxu1 }
  0xf1   :  { %v859_v10 = vcombine.low %v630_v63, %v632_v6  ;;  %v860_v11 = vcombine.low %v671_v0, %v673_v7 }
  0xf2   :  { %v634_v12 = vpop.f32.mrf.mxu0  ;;  %v675_v13 = vpop.f32.mrf.mxu1 }
  0xf3   :  { %v881_v15 = vrot.slane %v859_v10, %v1365_v58  ;;  %v888_v16 = vrot.slane %v860_v11, %v1365_v58 }
  0xf5   :  { %v890_v17 = vcombine.low %v881_v15, %v888_v16 }
  0xf7   :  { %v904_v19 = vrot.slane %v890_v17, %v1365_v58 }
  0xf9   :  { %v905_v20 = vcombine.low %v897_v18, %v904_v19 }
  0xfb   :  { %957 = vst [vmem:[%s1388_s3] sm:$0xff] %v905_v20 }
 0x100   :  { %v711_v21 = vpop.f32.mrf.mxu0  ;;  %v752_v22 = vpop.f32.mrf.mxu1 }
 0x101   :  { %v712_v29 = vadd.f32 %v711_v21, %v99_v53  ;;  %v753_v30 = vadd.f32 %v752_v22, %v99_v53 }
 0x102   :  { %v713_v23 = vpop.f32.mrf.mxu0  ;;  %v754_v24 = vpop.f32.mrf.mxu1 }
 0x103   :  { %v714_v3 = vadd.f32 %v713_v23, %v99_v53  ;;  %v755_v31 = vadd.f32 %v754_v24, %v99_v53 }
 0x104   :  { %v715_v25 = vpop.f32.mrf.mxu0  ;;  %v756_v26 = vpop.f32.mrf.mxu1 }
 0x105   :  { %v906_v32 = vcombine.low %v712_v29, %v714_v3  ;;  %v907_v33 = vcombine.low %v753_v30, %v755_v31 }
 0x106   :  { %v716_v27 = vpop.f32.mrf.mxu0  ;;  %v757_v28 = vpop.f32.mrf.mxu1 }
 0x107   :  { %v916_v36 = vrot.slane %v906_v32, %v1365_v58  ;;  %v923_v37 = vrot.slane %v907_v33, %v1365_v58 }
 0x109   :  { %v938_v50 = vcombine.low %v916_v36, %v923_v37 }
 0x10b   :  { %v946_v56 = vrot.slane %v938_v50, %v1365_v58 }
 0x114   :  { %v793_v34 = vpop.f32.mrf.mxu0  ;;  %v834_v35 = vpop.f32.mrf.mxu1 }
 0x115   :  { %v794_v40 = vadd.f32 %v793_v34, %v99_v53  ;;  %v835_v41 = vadd.f32 %v834_v35, %v99_v53 }
 0x116   :  { %v795_v38 = vpop.f32.mrf.mxu0  ;;  %v836_v39 = vpop.f32.mrf.mxu1 }
 0x117   :  { %v796_v42 = vadd.f32 %v795_v38, %v99_v53  ;;  %v837_v43 = vadd.f32 %v836_v39, %v99_v53 }
 0x118   :  { %v797_v44 = vpop.f32.mrf.mxu0  ;;  %v838_v45 = vpop.f32.mrf.mxu1 }
 0x119   :  { %v908_v46 = vcombine.low %v794_v40, %v796_v42  ;;  %v909_v47 = vcombine.low %v835_v41, %v837_v43 }
 0x11a   :  { %v798_v48 = vpop.f32.mrf.mxu0  ;;  %v839_v49 = vpop.f32.mrf.mxu1 }
 0x11b   :  { %v930_v51 = vrot.slane %v908_v46, %v1365_v58  ;;  %v937_v54 = vrot.slane %v909_v47, %v1365_v58 }
 0x11d   :  { %v939_v55 = vcombine.low %v930_v51, %v937_v54 }
 0x11f   :  { %v953_v57 = vrot.slane %v939_v55, %v1365_v58 }
 0x121   :  { %v954_v52 = vcombine.low %v946_v56, %v953_v57 }
 0x123   :  { %958 = vst [vmem:[%s1388_s3 + $0x8] sm:$0xff] %v954_v52 }

</bundles_post_ra>
